<compile_context>
chip_gen: v6e
topology: v6e:2x2x1
jax: 0.10.0
libtpu: 0.0.40
codegen_flags: <defaults>
</compile_context>

<pallas_src>
import math

import jax
import jax.numpy as jnp
from jax import lax
from jax.experimental import pallas as pl
from jax.experimental.pallas import tpu as pltpu

SCALE = 16.0


# --------------------------------------------------------------------------------------
# Kernels
# --------------------------------------------------------------------------------------
def _cosnorm_fused_kernel(ex_ref, w_ref, out_ref):
    # ex_ref : (B, D)        bf16  squashed embedding; constant block -> stays VMEM-resident
    # w_ref  : (tile_n, D)   f32   RAW weight rows for this class tile (single HBM pass)
    # out_ref: (B, tile_n)   f32   logits tile
    w = w_ref[...]
    # Row-normalize + fold SCALE in-kernel: rsqrt uses the EUP slot, mul/cast the VPU —
    # both hidden under the W DMA (kernel is W-streaming-bound).
    inv_norm = lax.rsqrt(jnp.sum(w * w, axis=1, keepdims=True))          # (tile_n, 1)
    ew = (w * (SCALE * inv_norm)).astype(jnp.bfloat16)                   # (tile_n, D)
    # (B, D) @ (tile_n, D)^T on the MXU, f32 accumulate; output stays lane-dense.
    out_ref[...] = lax.dot_general(
        ex_ref[...], ew,
        dimension_numbers=(((1,), (1,)), ((), ())),
        preferred_element_type=jnp.float32,
    )


def _cosnorm_cached_kernel(ex_ref, ew_ref, out_ref):
    # Same contraction, but ew_ref is pre-normalized, pre-scaled bf16 (C, D) weights
    # (2 B/elem streamed per call instead of 4).
    out_ref[...] = lax.dot_general(
        ex_ref[...], ew_ref[...],
        dimension_numbers=(((1,), (1,)), ((), ())),
        preferred_element_type=jnp.float32,
    )


# --------------------------------------------------------------------------------------
# Launcher
# --------------------------------------------------------------------------------------
def _launch(kernel, ex, w_arg, num_classes, tile_n):
    B, D = ex.shape
    C = num_classes
    w_bytes = jnp.dtype(w_arg.dtype).itemsize

    # Class-tile sizing: lane-dense multiples of 128, shrunk if double-buffered W tiles
    # would blow the per-core VMEM budget (v7x has 64 MiB / TC).
    if tile_n >= C:
        tile_n = C                                    # single full-width block
    else:
        tile_n = max(128, (tile_n // 128) * 128)
        while tile_n > 128 and 2 * tile_n * D * w_bytes > (40 << 20):
            tile_n //= 2
    n_tiles = pl.cdiv(C, tile_n)

    # Double-buffered W + ex + out, with headroom; v5e's default scoped VMEM is 16 MiB.
    est = 2 * (tile_n * D * w_bytes + B * D * 2 + B * tile_n * 4)
    vmem_limit = int(min(max(2 * est + (1 << 20), 32 << 20), 60 << 20))

    return pl.pallas_call(
        kernel,
        out_shape=jax.ShapeDtypeStruct((B, C), jnp.float32),
        grid_spec=pltpu.PrefetchScalarGridSpec(
            num_scalar_prefetch=0,
            grid=(n_tiles,),
            in_specs=[
                pl.BlockSpec((B, D), lambda j: (0, 0)),        # ex: constant block
                pl.BlockSpec((tile_n, D), lambda j: (j, 0)),   # W rows, native (C,D) layout
            ],
            out_specs=pl.BlockSpec((B, tile_n), lambda j: (0, j)),
        ),
        compiler_params=pltpu.CompilerParams(
            dimension_semantics=("parallel",),                 # v7x: 2 TCs split class tiles
            vmem_limit_bytes=vmem_limit,
        ),
    )(ex, w_arg)


# --------------------------------------------------------------------------------------
# Public API
# --------------------------------------------------------------------------------------
def normalize_weights(weight):
    """One-time preprocessing for weights reused across many forward calls:
    row-normalize, fold SCALE, cast to bf16.  Layout stays (C, D) — no transpose/pad."""
    wf = weight.astype(jnp.float32)
    inv = lax.rsqrt(jnp.sum(wf * wf, axis=1, keepdims=True))
    return (wf * (SCALE * inv)).astype(jnp.bfloat16)


def classifier_forward(x, weight=None, labels=None, use_labels=False, *,
                       ew=None, tile_n=512):
    """x: [B, D]. Pass either raw `weight` [C, D] (normalization fused in-kernel) or a
    precomputed `ew = normalize_weights(weight)` for the cached bf16 fast path.

    Returns (logits, logits): Classifier.margin == 0.0, so the label-margin branch of the
    reference module is never taken (labels/use_labels accepted for parity)."""
    B, D = x.shape

    # Input squashing: O(B*D), trivial; keep as plain XLA ops, cast to bf16 for the MXU.
    # Note: an all-zero row yields NaN (x / ||x||), matching the PyTorch reference.
    xf = x.astype(jnp.float32)
    norm2 = jnp.sum(xf * xf, axis=1, keepdims=True)                      # (B, 1)
    ex = (xf * (jnp.sqrt(norm2) / (1.0 + norm2))).astype(jnp.bfloat16)   # (B, D)

    if ew is not None:
        C, D2 = ew.shape
        assert D == D2
        logits = _launch(_cosnorm_cached_kernel, ex, ew.astype(jnp.bfloat16), C, tile_n)
    else:
        C, D2 = weight.shape
        assert D == D2
        logits = _launch(_cosnorm_fused_kernel, ex, weight.astype(jnp.float32), C, tile_n)

    # margin == 0.0 in Classifier -> `other` is just the logits.
    return logits, logits


def reference_forward(x, weight):
    norm_x = jnp.linalg.norm(x, axis=1, keepdims=True)
    exr = (norm_x ** 2 / (1.0 + norm_x ** 2)) * (x / norm_x)
    ewr = weight / jnp.linalg.norm(weight, axis=1, keepdims=True)
    logits = (SCALE * exr) @ ewr.T
    return logits, logits


if __name__ == "__main__":
    # Small shapes consistent with the module (real class count, scaled-down feat_dim).
    batch, feat_dim, num_classes = 8, 256, 1000

    key = jax.random.PRNGKey(0)
    kx, kw = jax.random.split(key)

    x = jax.random.normal(kx, (batch, feat_dim), dtype=jnp.float32)

    # nn.Linear-style reset_parameters: uniform(-stdv, stdv), stdv = 1/sqrt(in_dims).
    stdv = 1.0 / math.sqrt(feat_dim)
    weight = jax.random.uniform(
        kw, (num_classes, feat_dim), dtype=jnp.float32, minval=-stdv, maxval=stdv
    )

    # Fused path (normalization inside the kernel, single f32 pass over W).
    logits, other = classifier_forward(x, weight)
    jax.block_until_ready((logits, other))

    # Cached path (bf16 normalized weights precomputed once, reused per call).
    ew = normalize_weights(weight)
    logits_cached, _ = classifier_forward(x, ew=ew)
    jax.block_until_ready(logits_cached)

    ref_logits, _ = reference_forward(x, weight)
    assert logits.shape == (batch, num_classes)
    # bf16 matmul operands -> tolerance loosened vs. the pure-f32 reference.
    assert jnp.allclose(logits, ref_logits, atol=2e-2, rtol=2e-2), "fused path mismatch"
    assert jnp.allclose(logits_cached, ref_logits, atol=2e-2, rtol=2e-2), "cached path mismatch"
    assert jnp.array_equal(logits, other)

    print("KERNEL_OK")
</pallas_src>

<mosaic_0001>
module attributes {stable_mosaic.version = 11 : i64} {
  func.func @_cosnorm_fused_kernel(%arg0: i32, %arg1: memref<8x256xbf16, #tpu.memory_space<vmem>>, %arg2: memref<512x256xf32, #tpu.memory_space<vmem>>, %arg3: memref<8x512xf32, #tpu.memory_space<vmem>>) attributes {dimension_semantics = [#tpu.dimension_semantics<parallel>], iteration_bounds = array<i64: 2>, scalar_prefetch = 0 : i64, scratch_operands = 0 : i64, tpu.core_type = #tpu.core_type<tc>, window_params = [{pipeline_mode = #tpu.pipeline_mode<synchronous>, transform_indices = @transform_0, window_bounds = array<i64: 8, 256>}, {transform_indices = @transform_1, window_bounds = array<i64: 512, 256>}, {transform_indices = @transform_2, window_bounds = array<i64: 8, 512>}]} {
    %c0 = arith.constant 0 : index
    %c0_0 = arith.constant 0 : index
    %0 = vector.load %arg2[%c0, %c0_0] : memref<512x256xf32, #tpu.memory_space<vmem>>, vector<512x256xf32>
    %1 = arith.mulf %0, %0 : vector<512x256xf32>
    %cst = arith.constant dense<0.000000e+00> : vector<512xf32>
    %2 = vector.multi_reduction <add>, %1, %cst [1] : vector<512x256xf32> to vector<512xf32>
    %3 = vector.shape_cast %2 : vector<512xf32> to vector<512x1xf32>
    %4 = math.rsqrt %3 : vector<512x1xf32>
    %cst_1 = arith.constant 1.600000e+01 : f32
    %5 = vector.broadcast %cst_1 : f32 to vector<512x1xf32>
    %6 = arith.mulf %5, %4 : vector<512x1xf32>
    %7 = vector.broadcast %6 : vector<512x1xf32> to vector<512x256xf32>
    %8 = arith.mulf %0, %7 : vector<512x256xf32>
    %9 = arith.truncf %8 : vector<512x256xf32> to vector<512x256xbf16>
    %c0_2 = arith.constant 0 : index
    %c0_3 = arith.constant 0 : index
    %10 = vector.load %arg1[%c0_2, %c0_3] : memref<8x256xbf16, #tpu.memory_space<vmem>>, vector<8x256xbf16>
    %cst_4 = arith.constant dense<0.000000e+00> : vector<8x512xf32>
    %11 = tpu.matmul %10, %9, %cst_4 {dimension_numbers = #tpu.dot_dimension_numbers<[1], [1], [0], [0], [0, 0, 1, 0], [], []>} : vector<8x256xbf16>, vector<512x256xbf16>, vector<8x512xf32> -> vector<8x512xf32>
    %c0_5 = arith.constant 0 : index
    %c0_6 = arith.constant 0 : index
    %12 = vector.load %arg3[%c0_5, %c0_6] : memref<8x512xf32, #tpu.memory_space<vmem>>, vector<8x512xf32>
    tpu.vector_store %arg3[%c0_5, %c0_6], %11 {strides = array<i32>} : memref<8x512xf32, #tpu.memory_space<vmem>>, vector<8x512xf32>,
    return
  }
  func.func @transform_0(%arg0: i32) -> (i32, i32) {
    %c0_i32 = arith.constant 0 : i32
    %c0_i32_0 = arith.constant 0 : i32
    %c0_i32_1 = arith.constant 0 : i32
    return %c0_i32, %c0_i32_0 : i32, i32
  }
  func.func @transform_1(%arg0: i32) -> (i32, i32) {
    %c0_i32 = arith.constant 0 : i32
    %c0_i32_0 = arith.constant 0 : i32
    return %arg0, %c0_i32 : i32, i32
  }
  func.func @transform_2(%arg0: i32) -> (i32, i32) {
    %c0_i32 = arith.constant 0 : i32
    %c0_i32_0 = arith.constant 0 : i32
    return %c0_i32, %arg0 : i32, i32
  }
}

</mosaic_0001>

<bundles_post_ra>
// kernel: tpu_custom_call.1
= control target key start
LH: loop header
LB: loop body
LE: loop exit
PB: predicated region body
PF: predicated region fallthrough
CT: control target
= control target key end

     0   :  { %7 = vsyncpa [#allocation3], 0  ;;  %s2362_s0 = inlined_call_operand.hbm [shape: bf16[8,256], index: 0, kind: input, shape index: {}]   ;;  %s2363_s1 = inlined_call_operand.hbm [shape: f32[1000,256], index: 1, kind: input, shape index: {}]   ;;  %s2364_s2 = inlined_call_operand.hbm [shape: f32[8,1000], index: 2, kind: output, shape index: {}]  }
   0x1   :  { %8 = vsyncpa [#allocation6], 0 }
   0x2   :  { %10 = vsyncpa [#allocation6 + $0x1], 0 }
   0x3   :  { %11 = vsyncpa [#allocation4], 0 }
   0x4   :  { %13 = vsyncpa [#allocation4 + $0x1], 0  ;;  %s1534_s9 = smov 0   ;;  %s1536_s10 = smov 0  }
   0x5   :  { %s1538_s11 = smov 0   ;;  %s1540_s12 = smov 0  }
   0x6 LB: > { %s1555_s13 = sadd.s32 4294967295, %s1512_s12   ;;  %s1149_s14 = sadd.s32 4294967294, %s1512_s12   ;;  %s1512_s12 = sphi %s1540_s12, %s2554_s12   ;;  %s1508_s11 = sphi %s1538_s11, %s2553_s11   ;;  %s1504_s10 = sphi %s1536_s10, %s2552_s10   ;;  %s1500_s9 = sphi %s1534_s9, %s2551_s9  }
   0x7   : > { %s1559_s15 = sadd.s32 1, %s1512_s12   ;;  %s47_s16 = sadd.s32 1, %s1508_s11 }
   0x8   : > { %s44_s17 = ssub.s32 %s1512_s12, %s1559_s15  ;;  %p54_p0 = scmp.ne.s32.totalorder %s1508_s11, %s1504_s10 }
   0x9   : > { %p45_p1 = scmp.eq.s32.totalorder %s44_s17, 0  ;;  %p55_p2 = scmp.eq.s32.totalorder %s1512_s12, 0 }
   0xa   : > { %p60_p3 = scmp.ne.s32.totalorder %s1504_s10, %s1500_s9  ;;  %p61_p4 = scmp.eq.s32.totalorder %s1555_s13, 0 }
   0xb   : > { %s1571_s18 = scalar_select %p45_p1, %s1508_s11, %s47_s16  }
   0xc   : > { %p1573_p5 = por %p55_p2, %p54_p0  ;;  %p1579_p6 = por %p61_p4, %p60_p3 }
   0xd   : > { %p84_p7 = scmp.eq.s32.totalorder %s1555_s13, 1  ;;  %p90_p8 = scmp.eq.s32.totalorder %s1149_s14, 1 }
   0xe   : > { %s2427_s20 = scalar_select %p1579_p6, 1, 0 }
   0xf   : > { %p1150_p9 = scmp.ge.s32.totalorder %s1512_s12, 1  ;;  %p97_p10 = scmp.lt.s32.totalorder %s1512_s12, 3 }
  0x10   : > { %p1586_p11 = por %p84_p7, %p54_p0  ;;  %p1590_p12 = por %p90_p8, %p60_p3 }
  0x11   : > { %p1594_p13 = pnand %p1150_p9, %p97_p10  ;;  %s1514_s24 = smov [#allocation2]  }
  0x12   : > { %s2428_s21 = scalar_select %p1586_p11, 1, 0 }
  0x13   : > { %s2429_s22 = scalar_select %p1590_p12, 1, 0 }
  0x14   : > { %p1184_p1 = pneg %p1594_p13  ;;  %s110_s25 = sshll.u32 %s1514_s24, 4  ;;  %s111_s25 = int_to_ptr.vmem [resolvable:$true] %s110_s25 }
  0x15   : > { %s1403_s26 = scalar_lea.vmem %s111_s25, 128  ;;  %p1411_p8 = scmp.lt.s32.totalorder %s111_s25, %s111_s25 }
  0x16   : > { %p1185_p2 = pnand %p1184_p1, %p61_p4  ;;  %p1404_p7 = scmp.ne.s32.totalorder %s111_s25, %s1403_s26 }
  0x17   : > { %p1412_p6 = scmp.lt.s32.totalorder %s1403_s26, %s1403_s26 }
  0x18   : > { %p1394_p0 = pneg %p1185_p2 }
  0x19   : > { %p1413_p12 = por %p1412_p6, %p1411_p8 }
  0x1a   : > { %p1406_p11 = pnand %p1404_p7, %p1394_p0 }
  0x1c   : > { %p1407_p3 = pneg %p1406_p11 }
  0x1e   : > { %p1414_p9 = pnand %p1413_p12, %p1407_p3 }
  0x20   : > { %1417 = shalt.err (!%p1414_p9)
}
  0x21   : > { %1187 = dma.hbm_to_vmem [thread:$0]  (!%p1185_p2), %s2362_s0, 128, %s111_s25, [#allocation3]  }
  0x22   : > { %p2367_p10 = scmp.ge.s32.totalorder %s1512_s12, 2 }
  0x24   : > { %117 = sbr.rel (%p2367_p10) target bundleno = 73 (0x49), region = 20 }
  0x29   : > { %120 = sbr.rel (!%p1573_p5) target bundleno = 73 (0x49), region = 24  ;;  %s121_s29 = sand.u32 (%p1573_p5), 1, %s1508_s11  }
  0x2a   : > { %s1154_s30 = sshll.u32 (%p1573_p5), %s1512_s12, 6  ;;  %s1153_s3 = sshll.u32 (%p1573_p5), %s121_s29, 10 }
  0x2b   : > { %s127_s4 = ssub.s32 (%p1573_p5), 125, %s1154_s30  ;;  %s1615_s7 = scalar_lea.sflag (%p1573_p5), [#allocation6], %s121_s29 }
  0x2c   : > { %p128_p6 = scmp.lt.s32.totalorder (%p1573_p5), %s127_s4, 64  ;;  %s125_s8 = scalar_lea.vmem (%p1573_p5), [#allocation5], %s1153_s3 }
  0x2e   : > { %s2556_s4 = smov (!%p128_p6, %s127_s4), 64 }
  0x2f   : > { %s1612_s5 = sshll.u32 %s2556_s4, 8 }
  0x30   : > { %s133_s6 = ssub.s32 16384, %s1612_s5 }
  0x31   : > { %134 = vsyncadd %s1615_s7, %s133_s6  ;;  %p1157_p5 = scmp.ne.s32.totalorder %s1612_s5, 0  ;;  %s1175_s14 = sshll.u32 %s1512_s12, 14 }
  0x32   : > { %s1623_s19 = scalar_lea.hbm %s2363_s1, %s1175_s14  ;;  %s140_s24 = sshll.u32 %s125_s8, 4  ;;  %s1625_s24 = int_to_ptr.vmem [resolvable:$true] %s140_s24 }
  0x33   : > { %s1418_s25 = scalar_lea.hbm %s1623_s19, %s1612_s5  ;;  %s1422_s28 = scalar_lea.hbm %s2363_s1, 32000 }
  0x34   : > { %p1419_p11 = scmp.ne.s32.totalorder %s1623_s19, %s1418_s25  ;;  %p1423_p2 = scmp.lt.s32.totalorder %s1623_s19, %s2363_s1 }
  0x35   : > { %p1424_p0 = scmp.lt.s32.totalorder %s1422_s28, %s1418_s25 }
  0x36   : > { %p1420_p12 = pnand %p1419_p11, %p1157_p5 }
  0x37   : > { %p1425_p7 = por %p1424_p0, %p1423_p2 }
  0x38   : > { %p1421_p1 = pneg %p1420_p12 }
  0x3a   : > { %p1426_p3 = pnand %p1425_p7, %p1421_p1 }
  0x3c   : > { %1429 = shalt.err (!%p1426_p3)
}
  0x3d   : > { %s1430_s3 = scalar_lea.vmem %s1625_s24, %s1612_s5  ;;  %s1515_s4 = smov [#allocation5]  }
  0x3e   : > { %p1431_p8 = scmp.ne.s32.totalorder %s1625_s24, %s1430_s3  ;;  %s1434_s6 = sshll.u32 %s1515_s4, 4  ;;  %s1435_s6 = int_to_ptr.vmem [resolvable:$false] %s1434_s6 }
  0x3f   : > { %s1436_s8 = scalar_lea.vmem %s1435_s6, 32768  ;;  %p1437_p11 = scmp.lt.s32.totalorder %s1625_s24, %s1435_s6 }
  0x40   : > { %p1432_p9 = pnand %p1431_p8, %p1157_p5  ;;  %p1438_p12 = scmp.lt.s32.totalorder %s1436_s8, %s1430_s3 }
  0x42   : > { %p1433_p6 = pneg %p1432_p9  ;;  %p1439_p10 = por %p1438_p12, %p1437_p11 }
  0x44   : > { %p1440_p2 = pnand %p1439_p10, %p1433_p6 }
  0x46   : > { %1443 = shalt.err (!%p1440_p2)
}
  0x47   : > { %s1516_s14 = smov 256   ;;  %s1517_s16 = smov 16  }
  0x48   : > { %146 = dma.hbm_to_vmem [thread:$0]  (%p1157_p5), %s1623_s19, %s1612_s5, %s1625_s24, %s1615_s7, %s1516_s14, %s1516_s14, %s1517_s16  }
  0x49 PF: > { %152 = sbr.rel (%p1594_p13) target bundleno = 588 (0x24c), region = 28 }
  0x4e   : > { %1487 = dma.done.wait (%p61_p4), [#allocation3], 128  }
  0x4f   : > { %1489 = vsyncadd (%p61_p4), [#allocation3], 4294967168  ;;  %s1658_s17 = sand.u32 1, %s1504_s10   ;;  %p2431_p10 = scmp.ne.s32.totalorder %s2427_s20, 0 }
  0x50   : > { %s1164_s25 = sshll.u32 %s1658_s17, 10  ;;  %s159_s26 = scalar_lea.sflag [#allocation6], %s1658_s17 }
  0x51   : > { %s1662_s5 = scalar_lea.vmem [#allocation5], %s1164_s25 }
  0x52   : > { %1491 = dma.done.wait (%p2431_p10), %s159_s26, 16384  }
  0x53   : > { %1493 = vsyncadd (%p2431_p10), %s159_s26, 4294950912  ;;  %v1669_v0 = vld [vmem:[%s1662_s5 + $0x2e0] sm:$0xff]  ;;  %v1672_v1 = vld [vmem:[%s1662_s5 + $0x2e8] sm:$0xff]  ;;  %s1165_s20 = sshll.u32 %s1658_s17, 5  ;;  %s1176_s19 = sshll.u32 %s1555_s13, 9 }
  0x54   : > { %v1675_v2 = vld [vmem:[%s1662_s5 + $0xe0] sm:$0xff]  ;;  %v410_v3 = vmul.f32 %v1669_v0, %v1669_v0  ;;  %v411_v4 = vmul.f32 %v1672_v1, %v1672_v1  ;;  %v1682_v5 = vld [vmem:[%s1662_s5 + $0xe8] sm:$0xff]  ;;  %v1687_v7 = vld [vmem:[%s1662_s5 + $0x2f0] sm:$0xff]  ;;  %s182_s23 = scalar_lea.vmem [#allocation7], %s1165_s20  ;;  %s2321_s28 = scalar_lea.hbm %s2364_s2, %s1176_s19 }
  0x55   : > { %v346_v6 = vmul.f32 %v1675_v2, %v1675_v2  ;;  %v1690_v8 = vld [vmem:[%s1662_s5 + $0x2f8] sm:$0xff]  ;;  %v347_v9 = vmul.f32 %v1682_v5, %v1682_v5  ;;  %v412_v10 = vmul.f32 %v1687_v7, %v1687_v7  ;;  %v1699_v12 = vld [vmem:[%s1662_s5 + $0xf0] sm:$0xff]  ;;  %v1715_v19 = vld [vmem:[%s1662_s5 + $0xc0] sm:$0xff]  ;;  %s1067_s7 = sshll.u32 %s182_s23, 4  ;;  %s1053_s13 = scalar_lea.sflag [#allocation4], %s1658_s17  ;;  %s2316_s7 = int_to_ptr.vmem [resolvable:$true] %s1067_s7 }
  0x56   : > { %v413_v11 = vmul.f32 %v1690_v8, %v1690_v8  ;;  %v1702_v13 = vld [vmem:[%s1662_s5 + $0xf8] sm:$0xff]  ;;  %v1705_v14 = vld [vmem:[%s1662_s5 + $0xd0] sm:$0xff]  ;;  %v584_v15 = vadd.f32 %v411_v4, %v410_v3  ;;  %v348_v16 = vmul.f32 %v1699_v12, %v1699_v12  ;;  %v1718_v20 = vld [vmem:[%s1662_s5 + $0xc8] sm:$0xff]  ;;  %v342_v26 = vmul.f32 %v1715_v19, %v1715_v19  ;;  %s1444_s29 = scalar_lea.vmem %s2316_s7, 512  ;;  %p2548_p13 = scmp.ne.s32.totalorder %s2428_s21, 0 }
  0x57   : > { %v349_v17 = vmul.f32 %v1702_v13, %v1702_v13  ;;  %v1712_v18 = vld [vmem:[%s1662_s5 + $0xd8] sm:$0xff]  ;;  %v488_v21 = vadd.f32 %v347_v9, %v346_v6  ;;  %v344_v23 = vmul.f32 %v1705_v14, %v1705_v14  ;;  %v343_v27 = vmul.f32 %v1718_v20, %v1718_v20  ;;  %v1729_v28 = vld [vmem:[%s1662_s5 + $0x2d0] sm:$0xff]  ;;  %v1735_v30 = vld [vmem:[%s1662_s5 + $0x2c0] sm:$0xff]  ;;  %p1445_p4 = scmp.ne.s32.totalorder %s2316_s7, %s1444_s29  ;;  %s1518_s30 = smov [#allocation7]  }
  0x58   : > { %585 = vadd.xlane.f32.xlu1 %v584_v15  ;;  %v587_v22 = vadd.f32 %v413_v11, %v412_v10  ;;  %v345_v24 = vmul.f32 %v1712_v18, %v1712_v18  ;;  %v1732_v29 = vld [vmem:[%s1662_s5 + $0x2d8] sm:$0xff]  ;;  %v1738_v31 = vld [vmem:[%s1662_s5 + $0x2c8] sm:$0xff]  ;;  %v408_v33 = vmul.f32 %v1729_v28, %v1729_v28  ;;  %v406_v36 = vmul.f32 %v1735_v30, %v1735_v30  ;;  %v1749_v38 = vld [vmem:[%s1662_s5 + $0xb0] sm:$0xff]  ;;  %s1448_s3 = sshll.u32 %s1518_s30, 4  ;;  %s1449_s3 = int_to_ptr.vmem [resolvable:$false] %s1448_s3 }
  0x59   : > { %489 = vadd.xlane.f32.xlu0 %v488_v21  ;;  %v491_v25 = vadd.f32 %v349_v17, %v348_v16  ;;  %v409_v34 = vmul.f32 %v1732_v29, %v1732_v29  ;;  %v482_v35 = vadd.f32 %v343_v27, %v342_v26  ;;  %v407_v37 = vmul.f32 %v1738_v31, %v1738_v31  ;;  %v1752_v39 = vld [vmem:[%s1662_s5 + $0xb8] sm:$0xff]  ;;  %v1755_v40 = vld [vmem:[%s1662_s5 + $0xa0] sm:$0xff]  ;;  %v1758_v41 = vld [vmem:[%s1662_s5 + $0xa8] sm:$0xff]  ;;  %p1446_p5 = pnand %p1445_p4, %p2548_p13  ;;  %s1450_s4 = scalar_lea.vmem %s1449_s3, 1024 }
  0x5a   : > { %v485_v32 = vadd.f32 %v345_v24, %v344_v23  ;;  %v340_v43 = vmul.f32 %v1749_v38, %v1749_v38  ;;  %v341_v44 = vmul.f32 %v1752_v39, %v1752_v39  ;;  %v338_v46 = vmul.f32 %v1755_v40, %v1755_v40  ;;  %v1769_v48 = vld [vmem:[%s1662_s5 + $0x2b0] sm:$0xff]  ;;  %v1772_v49 = vld [vmem:[%s1662_s5 + $0x2b8] sm:$0xff]  ;;  %v1775_v50 = vld [vmem:[%s1662_s5 + $0x2a0] sm:$0xff]  ;;  %p1451_p0 = scmp.lt.s32.totalorder %s2316_s7, %s1449_s3  ;;  %p1452_p7 = scmp.lt.s32.totalorder %s1450_s4, %s1444_s29 }
  0x5b   : > { %v581_v42 = vadd.f32 %v409_v34, %v408_v33  ;;  %v578_v45 = vadd.f32 %v407_v37, %v406_v36  ;;  %v339_v47 = vmul.f32 %v1758_v41, %v1758_v41  ;;  %v1778_v51 = vld [vmem:[%s1662_s5 + $0x2a8] sm:$0xff]  ;;  %v404_v53 = vmul.f32 %v1769_v48, %v1769_v48  ;;  %v1789_v58 = vld [vmem:[%s1662_s5 + $0x90] sm:$0xff]  ;;  %v1792_v59 = vld [vmem:[%s1662_s5 + $0x98] sm:$0xff]  ;;  %p1447_p1 = pneg %p1446_p5 }
  0x5c   : > { %588 = vadd.xlane.f32.xlu1 %v587_v22  ;;  %v479_v52 = vadd.f32 %v341_v44, %v340_v43  ;;  %v405_v54 = vmul.f32 %v1772_v49, %v1772_v49  ;;  %v402_v56 = vmul.f32 %v1775_v50, %v1775_v50  ;;  %v403_v57 = vmul.f32 %v1778_v51, %v1778_v51  ;;  %v1795_v60 = vld [vmem:[%s1662_s5 + $0x80] sm:$0xff]  ;;  %v1798_v61 = vld [vmem:[%s1662_s5 + $0x88] sm:$0xff]  ;;  %v1809_v10 = vld [vmem:[%s1662_s5 + $0x290] sm:$0xff]  ;;  %p1453_p3 = por %p1452_p7, %p1451_p0 }
  0x5d   : > { %492 = vadd.xlane.f32.xlu0 %v491_v25  ;;  %v476_v55 = vadd.f32 %v339_v47, %v338_v46  ;;  %v336_v63 = vmul.f32 %v1789_v58, %v1789_v58  ;;  %v337_v3 = vmul.f32 %v1792_v59, %v1792_v59  ;;  %v334_v6 = vmul.f32 %v1795_v60, %v1795_v60  ;;  %v1812_v11 = vld [vmem:[%s1662_s5 + $0x298] sm:$0xff]  ;;  %v1815_v15 = vld [vmem:[%s1662_s5 + $0x280] sm:$0xff]  ;;  %v1818_v16 = vld [vmem:[%s1662_s5 + $0x288] sm:$0xff] }
  0x5e   : > { %v575_v62 = vadd.f32 %v405_v54, %v404_v53  ;;  %v572_v4 = vadd.f32 %v403_v57, %v402_v56  ;;  %v335_v9 = vmul.f32 %v1798_v61, %v1798_v61  ;;  %v400_v21 = vmul.f32 %v1809_v10, %v1809_v10  ;;  %v1829_v26 = vld [vmem:[%s1662_s5 + $0x70] sm:$0xff]  ;;  %v1832_v27 = vld [vmem:[%s1662_s5 + $0x78] sm:$0xff]  ;;  %v1838_v33 = vld [vmem:[%s1662_s5 + $0x68] sm:$0xff]  ;;  %p1454_p8 = pnand %p1453_p3, %p1447_p1 }
  0x5f   : > { %v473_v17 = vadd.f32 %v337_v3, %v336_v63  ;;  %v401_v22 = vmul.f32 %v1812_v11, %v1812_v11  ;;  %v398_v24 = vmul.f32 %v1815_v15, %v1815_v15  ;;  %v399_v25 = vmul.f32 %v1818_v16, %v1818_v16  ;;  %v1849_v44 = vld [vmem:[%s1662_s5 + $0x270] sm:$0xff]  ;;  %v1855_v46 = vld [vmem:[%s1662_s5 + $0x260] sm:$0xff]  ;;  %v1858_v47 = vld [vmem:[%s1662_s5 + $0x268] sm:$0xff] }
  0x60   : > { %486 = vadd.xlane.f32.xlu1 %v485_v32  ;;  %v470_v23 = vadd.f32 %v335_v9, %v334_v6  ;;  %v1835_v32 = vld [vmem:[%s1662_s5 + $0x60] sm:$0xff]  ;;  %v333_v36 = vmul.f32 %v1832_v27, %v1832_v27  ;;  %v331_v43 = vmul.f32 %v1838_v33, %v1838_v33  ;;  %2432 = vst [vmem:[#allocation11_spill] sm:$0xff] %v1855_v46  ;;  %2433 = vst [vmem:[#allocation12_spill] sm:$0xff] %v1858_v47  ;;  %v1872_v63 = vld [vmem:[%s1662_s5 + $0x58] sm:$0xff] }
  0x61   : > { %483 = vadd.xlane.f32.xlu0 %v482_v35  ;;  %v569_v34 = vadd.f32 %v401_v22, %v400_v21  ;;  %v332_v35 = vmul.f32 %v1829_v26, %v1829_v26  ;;  %v566_v37 = vadd.f32 %v399_v25, %v398_v24  ;;  %v396_v53 = vmul.f32 %v1849_v44, %v1849_v44  ;;  %v1875_v3 = vld [vmem:[%s1662_s5 + $0x40] sm:$0xff]  ;;  %v1889_v24 = vld [vmem:[%s1662_s5 + $0x250] sm:$0xff]  ;;  %v1892_v25 = vld [vmem:[%s1662_s5 + $0x258] sm:$0xff] }
  0x62   : > { %v394_v56 = vmul.f32 %v1855_v46, %v1855_v46  ;;  %v395_v57 = vmul.f32 %v1858_v47, %v1858_v47  ;;  %2435 = vst [vmem:[#allocation14_spill] sm:$0xff] %v1872_v63  ;;  %2436 = vst [vmem:[#allocation15_spill] sm:$0xff] %v1875_v3  ;;  %v326_v22 = vmul.f32 %v1875_v3, %v1875_v3  ;;  %v299_v3 = vld [vmem:[%s1662_s5 + $0x368] sm:$0xff] }
  0x63   : > { %2438 = vst [vmem:[#allocation17_spill] sm:$0xff] %v1889_v24  ;;  %2439 = vst [vmem:[#allocation18_spill] sm:$0xff] %v1892_v25 }
  0x64   : > { %582 = vadd.xlane.f32.xlu1 %v581_v42  ;;  %v330_v42 = vmul.f32 %v1835_v32, %v1835_v32  ;;  %v560_v21 = vadd.f32 %v395_v57, %v394_v56  ;;  %v1915_v56 = vld [vmem:[%s1662_s5 + $0x20] sm:$0xff]  ;;  %v1918_v57 = vld [vmem:[%s1662_s5 + $0x28] sm:$0xff] }
  0x65   : > { %579 = vadd.xlane.f32.xlu0 %v578_v45  ;;  %v1852_v45 = vld [vmem:[%s1662_s5 + $0x278] sm:$0xff]  ;;  %2444 = vst [vmem:[#allocation23_spill] sm:$0xff] %v1915_v56  ;;  %2445 = vst [vmem:[#allocation24_spill] sm:$0xff] %v1918_v57 }
  0x66   : > { %v397_v54 = vmul.f32 %v1852_v45, %v1852_v45 }
  0x68   : > { %480 = vadd.xlane.f32.xlu1 %v479_v52  ;;  %v467_v52 = vadd.f32 %v333_v36, %v332_v35  ;;  %v563_v6 = vadd.f32 %v397_v54, %v396_v53  ;;  %v1898_v35 = vld [vmem:[%s1662_s5 + $0x248] sm:$0xff]  ;;  %v1909_v54 = vld [vmem:[%s1662_s5 + $0x30] sm:$0xff] }
  0x69   : > { %477 = vadd.xlane.f32.xlu0 %v476_v55  ;;  %v464_v55 = vadd.f32 %v331_v43, %v330_v42  ;;  %2441 = vst [vmem:[#allocation20_spill] sm:$0xff] %v1898_v35  ;;  %v393_v42 = vmul.f32 %v1892_v25, %v1892_v25  ;;  %v391_v53 = vmul.f32 %v1898_v35, %v1898_v35  ;;  %2442 = vst [vmem:[#allocation21_spill] sm:$0xff] %v1909_v54  ;;  %v2124_v35 = vld [vmem:[%s1662_s5 + $0x398] sm:$0xff] }
  0x6a   : > { %2485 = vst [vmem:[#allocation64_spill] sm:$0xff] %v2124_v35 }
  0x6c   : > { %576 = vadd.xlane.f32.xlu1 %v575_v62  ;;  %v1869_v62 = vld [vmem:[%s1662_s5 + $0x50] sm:$0xff] }
  0x6d   : > { %573 = vadd.xlane.f32.xlu0 %v572_v4  ;;  %2434 = vst [vmem:[#allocation13_spill] sm:$0xff] %v1869_v62  ;;  %v1878_v4 = vld [vmem:[%s1662_s5 + $0x48] sm:$0xff]  ;;  %v328_v9 = vmul.f32 %v1869_v62, %v1869_v62 }
  0x6e   : > { %2437 = vst [vmem:[#allocation16_spill] sm:$0xff] %v1878_v4 }
  0x70   : > { %474 = vadd.xlane.f32.xlu1 %v473_v17  ;;  %v329_v17 = vmul.f32 %v1872_v63, %v1872_v63 }
  0x71   : > { %471 = vadd.xlane.f32.xlu0 %v470_v23  ;;  %v327_v23 = vmul.f32 %v1878_v4, %v1878_v4 }
  0x72   : > { %v461_v36 = vadd.f32 %v329_v17, %v328_v9  ;;  %v324_v9 = vmul.f32 %v1909_v54, %v1909_v54  ;;  %v1938_v54 = vld [vmem:[%s1662_s5 + $0x228] sm:$0xff] }
  0x73   : > { %v458_v43 = vadd.f32 %v327_v23, %v326_v22  ;;  %v322_v22 = vmul.f32 %v1915_v56, %v1915_v56  ;;  %v323_v23 = vmul.f32 %v1918_v57, %v1918_v57  ;;  %2449 = vst [vmem:[#allocation28_spill] sm:$0xff] %v1938_v54 }
  0x74   : > { %570 = vadd.xlane.f32.xlu1 %v569_v34  ;;  %v1895_v34 = vld [vmem:[%s1662_s5 + $0x240] sm:$0xff] }
  0x75   : > { %567 = vadd.xlane.f32.xlu0 %v566_v37  ;;  %2440 = vst [vmem:[#allocation19_spill] sm:$0xff] %v1895_v34  ;;  %v392_v37 = vmul.f32 %v1889_v24, %v1889_v24  ;;  %v452_v56 = vadd.f32 %v323_v23, %v322_v22  ;;  %v298_v24 = vld [vmem:[%s1662_s5 + $0x360] sm:$0xff] }
  0x78   : > { %468 = vadd.xlane.f32.xlu1 %v467_v52  ;;  %v390_v52 = vmul.f32 %v1895_v34, %v1895_v34  ;;  %v2121_v34 = vld [vmem:[%s1662_s5 + $0x390] sm:$0xff] }
  0x79   : > { %465 = vadd.xlane.f32.xlu0 %v464_v55  ;;  %v1912_v55 = vld [vmem:[%s1662_s5 + $0x38] sm:$0xff]  ;;  %2484 = vst [vmem:[#allocation63_spill] sm:$0xff] %v2121_v34 }
  0x7a   : > { %2443 = vst [vmem:[#allocation22_spill] sm:$0xff] %v1912_v55  ;;  %v325_v17 = vmul.f32 %v1912_v55, %v1912_v55  ;;  %v387_v55 = vmul.f32 %v1938_v54, %v1938_v54 }
  0x7c   : > { %564 = vadd.xlane.f32.xlu1 %v563_v6  ;;  %v557_v6 = vadd.f32 %v393_v42, %v392_v37  ;;  %v1932_v37 = vld [vmem:[%s1662_s5 + $0x238] sm:$0xff]  ;;  %v1935_v42 = vld [vmem:[%s1662_s5 + $0x220] sm:$0xff] }
  0x7d   : > { %561 = vadd.xlane.f32.xlu0 %v560_v21  ;;  %v554_v21 = vadd.f32 %v391_v53, %v390_v52  ;;  %2447 = vst [vmem:[#allocation26_spill] sm:$0xff] %v1932_v37  ;;  %2448 = vst [vmem:[#allocation27_spill] sm:$0xff] %v1935_v42  ;;  %v389_v53 = vmul.f32 %v1932_v37, %v1932_v37  ;;  %v386_v57 = vmul.f32 %v1935_v42, %v1935_v42 }
  0x7f   : > { %v548_v42 = vadd.f32 %v387_v55, %v386_v57 }
  0x80   : > { %462 = vadd.xlane.f32.xlu1 %v461_v36  ;;  %v1929_v36 = vld [vmem:[%s1662_s5 + $0x230] sm:$0xff] }
  0x81   : > { %459 = vadd.xlane.f32.xlu0 %v458_v43  ;;  %2446 = vst [vmem:[#allocation25_spill] sm:$0xff] %v1929_v36  ;;  %v455_v43 = vadd.f32 %v325_v17, %v324_v9  ;;  %v388_v52 = vmul.f32 %v1929_v36, %v1929_v36  ;;  %v1952_v9 = vld [vmem:[%s1662_s5 + $0x18] sm:$0xff]  ;;  %v1955_v17 = vld [vmem:[%s1662_s5] sm:$0xff]  ;;  %v1958_v36 = vld [vmem:[%s1662_s5 + $0x8] sm:$0xff] }
  0x82   : > { %2451 = vst [vmem:[#allocation30_spill] sm:$0xff] %v1952_v9  ;;  %2452 = vst [vmem:[#allocation31_spill] sm:$0xff] %v1955_v17  ;;  %v321_v23 = vmul.f32 %v1952_v9, %v1952_v9  ;;  %v318_v54 = vmul.f32 %v1955_v17, %v1955_v17  ;;  %v319_v37 = vmul.f32 %v1958_v36, %v1958_v36 }
  0x83   : > { %2453 = vst [vmem:[#allocation32_spill] sm:$0xff] %v1958_v36 }
  0x84   : > { %558 = vadd.xlane.f32.xlu1 %v557_v6  ;;  %v1949_v6 = vld [vmem:[%s1662_s5 + $0x10] sm:$0xff]  ;;  %v446_v17 = vadd.f32 %v319_v37, %v318_v54 }
  0x85   : > { %555 = vadd.xlane.f32.xlu0 %v554_v21  ;;  %2450 = vst [vmem:[#allocation29_spill] sm:$0xff] %v1949_v6  ;;  %v551_v21 = vadd.f32 %v389_v53, %v388_v52  ;;  %v320_v22 = vmul.f32 %v1949_v6, %v1949_v6  ;;  %v1972_v52 = vld [vmem:[%s1662_s5 + $0x218] sm:$0xff]  ;;  %v1975_v53 = vld [vmem:[%s1662_s5 + $0x200] sm:$0xff]  ;;  %v1978_v6 = vld [vmem:[%s1662_s5 + $0x208] sm:$0xff] }
  0x86   : > { %2455 = vst [vmem:[#allocation34_spill] sm:$0xff] %v1972_v52  ;;  %2456 = vst [vmem:[#allocation35_spill] sm:$0xff] %v1975_v53  ;;  %v385_v57 = vmul.f32 %v1972_v52, %v1972_v52  ;;  %v382_v36 = vmul.f32 %v1975_v53, %v1975_v53  ;;  %v383_v9 = vmul.f32 %v1978_v6, %v1978_v6 }
  0x87   : > { %2457 = vst [vmem:[#allocation36_spill] sm:$0xff] %v1978_v6 }
  0x88   : > { %456 = vadd.xlane.f32.xlu1 %v455_v43  ;;  %v1969_v43 = vld [vmem:[%s1662_s5 + $0x210] sm:$0xff]  ;;  %v542_v53 = vadd.f32 %v383_v9, %v382_v36 }
  0x89   : > { %453 = vadd.xlane.f32.xlu0 %v452_v56  ;;  %2454 = vst [vmem:[#allocation33_spill] sm:$0xff] %v1969_v43  ;;  %v449_v56 = vadd.f32 %v321_v23, %v320_v22  ;;  %v384_v55 = vmul.f32 %v1969_v43, %v1969_v43  ;;  %v1992_v22 = vld [vmem:[%s1662_s5 + $0x1f8] sm:$0xff]  ;;  %v1995_v23 = vld [vmem:[%s1662_s5 + $0x1e0] sm:$0xff]  ;;  %v1998_v43 = vld [vmem:[%s1662_s5 + $0x1e8] sm:$0xff] }
  0x8a   : > { %2459 = vst [vmem:[#allocation38_spill] sm:$0xff] %v1992_v22  ;;  %2460 = vst [vmem:[#allocation39_spill] sm:$0xff] %v1995_v23  ;;  %v381_v37 = vmul.f32 %v1992_v22, %v1992_v22  ;;  %v378_v6 = vmul.f32 %v1995_v23, %v1995_v23  ;;  %v379_v52 = vmul.f32 %v1998_v43, %v1998_v43 }
  0x8b   : > { %2461 = vst [vmem:[#allocation40_spill] sm:$0xff] %v1998_v43 }
  0x8c   : > { %552 = vadd.xlane.f32.xlu1 %v551_v21  ;;  %v1989_v21 = vld [vmem:[%s1662_s5 + $0x1f0] sm:$0xff]  ;;  %v536_v23 = vadd.f32 %v379_v52, %v378_v6 }
  0x8d   : > { %549 = vadd.xlane.f32.xlu0 %v548_v42  ;;  %2458 = vst [vmem:[#allocation37_spill] sm:$0xff] %v1989_v21  ;;  %v545_v42 = vadd.f32 %v385_v57, %v384_v55  ;;  %v380_v54 = vmul.f32 %v1989_v21, %v1989_v21  ;;  %v2012_v55 = vld [vmem:[%s1662_s5 + $0x3f8] sm:$0xff]  ;;  %v2015_v57 = vld [vmem:[%s1662_s5 + $0x3e0] sm:$0xff]  ;;  %v2018_v21 = vld [vmem:[%s1662_s5 + $0x3e8] sm:$0xff] }
  0x8e   : > { %2463 = vst [vmem:[#allocation42_spill] sm:$0xff] %v2012_v55  ;;  %2464 = vst [vmem:[#allocation43_spill] sm:$0xff] %v2015_v57  ;;  %v445_v9 = vmul.f32 %v2012_v55, %v2012_v55  ;;  %v442_v43 = vmul.f32 %v2015_v57, %v2015_v57  ;;  %v443_v22 = vmul.f32 %v2018_v21, %v2018_v21 }
  0x8f   : > { %2465 = vst [vmem:[#allocation44_spill] sm:$0xff] %v2018_v21 }
  0x90   : > { %450 = vadd.xlane.f32.xlu1 %v449_v56  ;;  %v2009_v56 = vld [vmem:[%s1662_s5 + $0x3f0] sm:$0xff]  ;;  %v632_v57 = vadd.f32 %v443_v22, %v442_v43 }
  0x91   : > { %447 = vadd.xlane.f32.xlu0 %v446_v17  ;;  %2462 = vst [vmem:[#allocation41_spill] sm:$0xff] %v2009_v56  ;;  %v539_v17 = vadd.f32 %v381_v37, %v380_v54  ;;  %v444_v36 = vmul.f32 %v2009_v56, %v2009_v56  ;;  %v2032_v54 = vld [vmem:[%s1662_s5 + $0x1d8] sm:$0xff]  ;;  %v2035_v37 = vld [vmem:[%s1662_s5 + $0x1c0] sm:$0xff]  ;;  %v2038_v56 = vld [vmem:[%s1662_s5 + $0x1c8] sm:$0xff] }
  0x92   : > { %2467 = vst [vmem:[#allocation46_spill] sm:$0xff] %v2032_v54  ;;  %2468 = vst [vmem:[#allocation47_spill] sm:$0xff] %v2035_v37  ;;  %v377_v52 = vmul.f32 %v2032_v54, %v2032_v54  ;;  %v374_v21 = vmul.f32 %v2035_v37, %v2035_v37  ;;  %v375_v55 = vmul.f32 %v2038_v56, %v2038_v56 }
  0x93   : > { %2469 = vst [vmem:[#allocation48_spill] sm:$0xff] %v2038_v56 }
  0x94   : > { %546 = vadd.xlane.f32.xlu1 %v545_v42  ;;  %v2029_v42 = vld [vmem:[%s1662_s5 + $0x1d0] sm:$0xff]  ;;  %v530_v37 = vadd.f32 %v375_v55, %v374_v21 }
  0x95   : > { %543 = vadd.xlane.f32.xlu0 %v542_v53  ;;  %2466 = vst [vmem:[#allocation45_spill] sm:$0xff] %v2029_v42  ;;  %v635_v53 = vadd.f32 %v445_v9, %v444_v36  ;;  %v376_v6 = vmul.f32 %v2029_v42, %v2029_v42  ;;  %v2052_v36 = vld [vmem:[%s1662_s5 + $0x3d8] sm:$0xff]  ;;  %v2055_v9 = vld [vmem:[%s1662_s5 + $0x3c0] sm:$0xff]  ;;  %v2058_v42 = vld [vmem:[%s1662_s5 + $0x3c8] sm:$0xff] }
  0x96   : > { %2471 = vst [vmem:[#allocation50_spill] sm:$0xff] %v2052_v36  ;;  %2472 = vst [vmem:[#allocation51_spill] sm:$0xff] %v2055_v9  ;;  %v441_v22 = vmul.f32 %v2052_v36, %v2052_v36  ;;  %v438_v56 = vmul.f32 %v2055_v9, %v2055_v9  ;;  %v439_v54 = vmul.f32 %v2058_v42, %v2058_v42 }
  0x97   : > { %2473 = vst [vmem:[#allocation52_spill] sm:$0xff] %v2058_v42 }
  0x98   : > { %540 = vadd.xlane.f32.xlu1 %v539_v17  ;;  %v2049_v17 = vld [vmem:[%s1662_s5 + $0x3d0] sm:$0xff]  ;;  %v626_v9 = vadd.f32 %v439_v54, %v438_v56 }
  0x99   : > { %537 = vadd.xlane.f32.xlu0 %v536_v23  ;;  %2470 = vst [vmem:[#allocation49_spill] sm:$0xff] %v2049_v17  ;;  %v533_v23 = vadd.f32 %v377_v52, %v376_v6  ;;  %v440_v43 = vmul.f32 %v2049_v17, %v2049_v17  ;;  %v2072_v6 = vld [vmem:[%s1662_s5 + $0x1b8] sm:$0xff]  ;;  %v2075_v52 = vld [vmem:[%s1662_s5 + $0x1a0] sm:$0xff]  ;;  %v2078_v17 = vld [vmem:[%s1662_s5 + $0x1a8] sm:$0xff] }
  0x9a   : > { %2475 = vst [vmem:[#allocation54_spill] sm:$0xff] %v2072_v6  ;;  %2476 = vst [vmem:[#allocation55_spill] sm:$0xff] %v2075_v52  ;;  %v373_v55 = vmul.f32 %v2072_v6, %v2072_v6  ;;  %v370_v42 = vmul.f32 %v2075_v52, %v2075_v52  ;;  %v371_v36 = vmul.f32 %v2078_v17, %v2078_v17 }
  0x9b   : > { %2477 = vst [vmem:[#allocation56_spill] sm:$0xff] %v2078_v17 }
  0x9c   : > { %636 = vadd.xlane.f32.xlu1 %v635_v53  ;;  %v2069_v53 = vld [vmem:[%s1662_s5 + $0x1b0] sm:$0xff]  ;;  %v524_v52 = vadd.f32 %v371_v36, %v370_v42 }
  0x9d   : > { %633 = vadd.xlane.f32.xlu0 %v632_v57  ;;  %2474 = vst [vmem:[#allocation53_spill] sm:$0xff] %v2069_v53  ;;  %v629_v57 = vadd.f32 %v441_v22, %v440_v43  ;;  %v372_v21 = vmul.f32 %v2069_v53, %v2069_v53  ;;  %v2092_v43 = vld [vmem:[%s1662_s5 + $0x3b8] sm:$0xff]  ;;  %v2095_v22 = vld [vmem:[%s1662_s5 + $0x3a0] sm:$0xff]  ;;  %v2098_v53 = vld [vmem:[%s1662_s5 + $0x3a8] sm:$0xff] }
  0x9e   : > { %2479 = vst [vmem:[#allocation58_spill] sm:$0xff] %v2092_v43  ;;  %2480 = vst [vmem:[#allocation59_spill] sm:$0xff] %v2095_v22  ;;  %v437_v54 = vmul.f32 %v2092_v43, %v2092_v43  ;;  %v434_v17 = vmul.f32 %v2095_v22, %v2095_v22  ;;  %v435_v6 = vmul.f32 %v2098_v53, %v2098_v53 }
  0x9f   : > { %2481 = vst [vmem:[#allocation60_spill] sm:$0xff] %v2098_v53 }
  0xa0   : > { %534 = vadd.xlane.f32.xlu1 %v533_v23  ;;  %v2089_v23 = vld [vmem:[%s1662_s5 + $0x3b0] sm:$0xff]  ;;  %v620_v36 = vadd.f32 %v435_v6, %v434_v17  ;;  %v432_v17 = vmul.f32 %v2121_v34, %v2121_v34  ;;  %v433_v6 = vmul.f32 %v2124_v35, %v2124_v35  ;;  %v2146_v34 = vld [vmem:[%s1662_s5 + $0x168] sm:$0xff] }
  0xa1   : > { %531 = vadd.xlane.f32.xlu0 %v530_v37  ;;  %2478 = vst [vmem:[#allocation57_spill] sm:$0xff] %v2089_v23  ;;  %v527_v37 = vadd.f32 %v373_v55, %v372_v21  ;;  %v436_v56 = vmul.f32 %v2089_v23, %v2089_v23  ;;  %v2110_v21 = vld [vmem:[%s1662_s5 + $0x198] sm:$0xff]  ;;  %v238_v55 = vld [vmem:[%s1662_s5 + $0x180] sm:$0xff]  ;;  %v2114_v23 = vld [vmem:[%s1662_s5 + $0x188] sm:$0xff] }
  0xa2   : > { %2482 = vst [vmem:[#allocation61_spill] sm:$0xff] %v2110_v21  ;;  %2483 = vst [vmem:[#allocation62_spill] sm:$0xff] %v2114_v23  ;;  %v369_v42 = vmul.f32 %v2110_v21, %v2110_v21  ;;  %v366_v22 = vmul.f32 %v238_v55, %v238_v55  ;;  %v367_v53 = vmul.f32 %v2114_v23, %v2114_v23  ;;  %v300_v23 = vld [vmem:[%s1662_s5 + $0x370] sm:$0xff]  ;;  %v301_v21 = vld [vmem:[%s1662_s5 + $0x378] sm:$0xff] }
  0xa3   : > { %v623_v43 = vadd.f32 %v437_v54, %v436_v56  ;;  %v2130_v56 = vld [vmem:[%s1662_s5 + $0x388] sm:$0xff]  ;;  %2489 = vst [vmem:[#allocation68_spill] sm:$0xff] %v2146_v34  ;;  %v617_v35 = vadd.f32 %v433_v6, %v432_v17  ;;  %v428_v17 = vmul.f32 %v300_v23, %v300_v23  ;;  %v429_v6 = vmul.f32 %v301_v21, %v301_v21 }
  0xa4   : > { %630 = vadd.xlane.f32.xlu1 %v629_v57  ;;  %v240_v57 = vld [vmem:[%s1662_s5 + $0x190] sm:$0xff]  ;;  %2487 = vst [vmem:[#allocation66_spill] sm:$0xff] %v2130_v56  ;;  %v431_v55 = vmul.f32 %v2130_v56, %v2130_v56  ;;  %v363_v56 = vmul.f32 %v2146_v34, %v2146_v34  ;;  %v230_v34 = vld [vmem:[%s1662_s5 + $0x140] sm:$0xff] }
  0xa5   : > { %627 = vadd.xlane.f32.xlu0 %v626_v9  ;;  %v368_v9 = vmul.f32 %v240_v57, %v240_v57  ;;  %v611_v25 = vadd.f32 %v429_v6, %v428_v17  ;;  %v358_v23 = vmul.f32 %v230_v34, %v230_v34  ;;  %v228_v34 = vld [vmem:[%s1662_s5 + $0x130] sm:$0xff] }
  0xa7   : > { %v521_v54 = vadd.f32 %v369_v42, %v368_v9  ;;  %v2142_v9 = vld [vmem:[%s1662_s5 + $0x178] sm:$0xff]  ;;  %v234_v42 = vld [vmem:[%s1662_s5 + $0x160] sm:$0xff] }
  0xa8   : > { %528 = vadd.xlane.f32.xlu1 %v527_v37  ;;  %v2127_v37 = vld [vmem:[%s1662_s5 + $0x380] sm:$0xff]  ;;  %2488 = vst [vmem:[#allocation67_spill] sm:$0xff] %v2142_v9 }
  0xa9   : > { %525 = vadd.xlane.f32.xlu0 %v524_v52  ;;  %2486 = vst [vmem:[#allocation65_spill] sm:$0xff] %v2127_v37  ;;  %v518_v52 = vadd.f32 %v367_v53, %v366_v22  ;;  %v430_v57 = vmul.f32 %v2127_v37, %v2127_v37  ;;  %v365_v53 = vmul.f32 %v2142_v9, %v2142_v9  ;;  %v231_v9 = vld [vmem:[%s1662_s5 + $0x148] sm:$0xff] }
  0xaa   : > { %v362_v37 = vmul.f32 %v234_v42, %v234_v42  ;;  %v233_v42 = vld [vmem:[%s1662_s5 + $0x158] sm:$0xff]  ;;  %v359_v21 = vmul.f32 %v231_v9, %v231_v9  ;;  %v226_v9 = vld [vmem:[%s1662_s5 + $0x120] sm:$0xff] }
  0xab   : > { %v614_v22 = vadd.f32 %v431_v55, %v430_v57  ;;  %v426_v57 = vmul.f32 %v298_v24, %v298_v24  ;;  %v427_v55 = vmul.f32 %v299_v3, %v299_v3  ;;  %v361_v4 = vmul.f32 %v233_v42, %v233_v42  ;;  %v296_v24 = vld [vmem:[%s1662_s5 + $0x350] sm:$0xff]  ;;  %v294_v3 = vld [vmem:[%s1662_s5 + $0x340] sm:$0xff] }
  0xac   : > { %624 = vadd.xlane.f32.xlu1 %v623_v43  ;;  %v236_v43 = vld [vmem:[%s1662_s5 + $0x170] sm:$0xff]  ;;  %v422_v17 = vmul.f32 %v294_v3, %v294_v3 }
  0xad   : > { %621 = vadd.xlane.f32.xlu0 %v620_v36  ;;  %v364_v36 = vmul.f32 %v236_v43, %v236_v43  ;;  %v232_v43 = vld [vmem:[%s1662_s5 + $0x150] sm:$0xff] }
  0xae   : > { %v360_v62 = vmul.f32 %v232_v43, %v232_v43  ;;  %v356_v43 = vmul.f32 %v228_v34, %v228_v34  ;;  %v223_v34 = vld [vmem:[%s1662_s5 + $0x108] sm:$0xff] }
  0xb0   : > { %522 = vadd.xlane.f32.xlu1 %v521_v54  ;;  %v515_v54 = vadd.f32 %v365_v53, %v364_v36  ;;  %v509_v36 = vadd.f32 %v361_v4, %v360_v62  ;;  %v424_v53 = vmul.f32 %v296_v24, %v296_v24  ;;  %v354_v4 = vmul.f32 %v226_v9, %v226_v9  ;;  %v291_v24 = vld [vmem:[%s1662_s5 + $0x328] sm:$0xff] }
  0xb1   : > { %519 = vadd.xlane.f32.xlu0 %v518_v52  ;;  %v512_v52 = vadd.f32 %v363_v56, %v362_v37  ;;  %v297_v37 = vld [vmem:[%s1662_s5 + $0x358] sm:$0xff]  ;;  %v295_v56 = vld [vmem:[%s1662_s5 + $0x348] sm:$0xff] }
  0xb2   : > { %v423_v6 = vmul.f32 %v295_v56, %v295_v56 }
  0xb4   : > { %618 = vadd.xlane.f32.xlu1 %v617_v35  ;;  %v608_v35 = vadd.f32 %v427_v55, %v426_v57  ;;  %v227_v57 = vld [vmem:[%s1662_s5 + $0x128] sm:$0xff]  ;;  %v602_v62 = vadd.f32 %v423_v6, %v422_v17  ;;  %v225_v17 = vld [vmem:[%s1662_s5 + $0x118] sm:$0xff]  ;;  %v222_v6 = vld [vmem:[%s1662_s5 + $0x100] sm:$0xff] }
  0xb5   : > { %615 = vadd.xlane.f32.xlu0 %v614_v22  ;;  %v425_v22 = vmul.f32 %v297_v37, %v297_v37 }
  0xb7   : > { %v605_v55 = vadd.f32 %v425_v22, %v424_v53  ;;  %v419_v22 = vmul.f32 %v291_v24, %v291_v24 }
  0xb8   : > { %516 = vadd.xlane.f32.xlu1 %v515_v54  ;;  %v506_v54 = vadd.f32 %v359_v21, %v358_v23  ;;  %v293_v23 = vld [vmem:[%s1662_s5 + $0x338] sm:$0xff]  ;;  %v290_v21 = vld [vmem:[%s1662_s5 + $0x320] sm:$0xff] }
  0xb9   : > { %513 = vadd.xlane.f32.xlu0 %v512_v52  ;;  %v229_v52 = vld [vmem:[%s1662_s5 + $0x138] sm:$0xff]  ;;  %v421_v56 = vmul.f32 %v293_v23, %v293_v23  ;;  %v418_v53 = vmul.f32 %v290_v21, %v290_v21 }
  0xba   : > { %v357_v42 = vmul.f32 %v229_v52, %v229_v52 }
  0xbc   : > { %612 = vadd.xlane.f32.xlu1 %v611_v25  ;;  %v355_v25 = vmul.f32 %v227_v57, %v227_v57  ;;  %v503_v37 = vadd.f32 %v357_v42, %v356_v43  ;;  %v353_v57 = vmul.f32 %v225_v17, %v225_v17  ;;  %v350_v43 = vmul.f32 %v222_v6, %v222_v6 }
  0xbd   : > { %609 = vadd.xlane.f32.xlu0 %v608_v35  ;;  %v292_v35 = vld [vmem:[%s1662_s5 + $0x330] sm:$0xff]  ;;  %v351_v42 = vmul.f32 %v223_v34, %v223_v34 }
  0xbe   : > { %v420_v3 = vmul.f32 %v292_v35, %v292_v35  ;;  %v289_v35 = vld [vmem:[%s1662_s5 + $0x318] sm:$0xff] }
  0xbf   : > { %v417_v24 = vmul.f32 %v289_v35, %v289_v35  ;;  %v494_v63 = vadd.f32 %v351_v42, %v350_v43 }
  0xc0   : > { %510 = vadd.xlane.f32.xlu1 %v509_v36  ;;  %v500_v36 = vadd.f32 %v355_v25, %v354_v4  ;;  %v599_v52 = vadd.f32 %v421_v56, %v420_v3  ;;  %v286_v4 = vld [vmem:[%s1662_s5 + $0x300] sm:$0xff]  ;;  %v287_v25 = vld [vmem:[%s1662_s5 + $0x308] sm:$0xff] }
  0xc1   : > { %507 = vadd.xlane.f32.xlu0 %v506_v54  ;;  %v224_v54 = vld [vmem:[%s1662_s5 + $0x110] sm:$0xff]  ;;  %v414_v46 = vmul.f32 %v286_v4, %v286_v4  ;;  %v415_v47 = vmul.f32 %v287_v25, %v287_v25 }
  0xc2   : > { %v352_v9 = vmul.f32 %v224_v54, %v224_v54 }
  0xc3   : > { %v590_v3 = vadd.f32 %v415_v47, %v414_v46 }
  0xc4   : > { %606 = vadd.xlane.f32.xlu1 %v605_v55  ;;  %v596_v55 = vadd.f32 %v419_v22, %v418_v53  ;;  %v497_v23 = vadd.f32 %v353_v57, %v352_v9 }
  0xc5   : > { %603 = vadd.xlane.f32.xlu0 %v602_v62  ;;  %v288_v62 = vld [vmem:[%s1662_s5 + $0x310] sm:$0xff] }
  0xc6   : > { %v416_v21 = vmul.f32 %v288_v62, %v288_v62  ;;  %v2180_v62 = vld [vmem:[#allocation2] sm:$0xff] }
  0xc8   : > { %504 = vadd.xlane.f32.xlu1 %v503_v37  ;;  %v593_v37 = vadd.f32 %v417_v24, %v416_v21  ;;  %v1167_v21 = vcombine.high %v2180_v62, %v2180_v62 }
  0xc9   : > { %501 = vadd.xlane.f32.xlu0 %v500_v36 }
  0xca   : > { %998 = vmatprep.mubr.bf16.mxu0 %v1167_v21  ;;  %1039 = vmatprep.mubr.bf16.mxu1 %v1167_v21 }
  0xcc   : > { %600 = vadd.xlane.f32.xlu1 %v599_v52 }
  0xcd   : > { %597 = vadd.xlane.f32.xlu0 %v596_v55 }
  0xd0   : > { %498 = vadd.xlane.f32.xlu1 %v497_v23 }
  0xd1   : > { %495 = vadd.xlane.f32.xlu0 %v494_v63 }
  0xd4   : > { %594 = vadd.xlane.f32.xlu1 %v593_v37 }
  0xd5   : > { %591 = vadd.xlane.f32.xlu0 %v590_v3 }
  0xe1   : > { %v586_v56 = vpop.xlane.xlu1 %585 }
  0xe2   : > { %1232 = vrsqrt.f32 %v586_v56  ;;  %v490_v36 = vpop.xlane.xlu0 %489 }
  0xe3   : > { %1234 = vrsqrt.f32 %v490_v36 }
  0xe5   : > { %v589_v53 = vpop.xlane.xlu1 %588 }
  0xe6   : > { %1236 = vrsqrt.f32 %v589_v53  ;;  %v493_v22 = vpop.xlane.xlu0 %492 }
  0xe7   : > { %1238 = vrsqrt.f32 %v493_v22 }
  0xe9   : > { %v487_v54 = vpop.xlane.xlu1 %486 }
  0xea   : > { %1240 = vrsqrt.f32 %v487_v54  ;;  %v484_v17 = vpop.xlane.xlu0 %483 }
  0xeb   : > { %1242 = vrsqrt.f32 %v484_v17 }
  0xed   : > { %v583_v6 = vpop.xlane.xlu1 %582 }
  0xee   : > { %1244 = vrsqrt.f32 %v583_v6  ;;  %v580_v34 = vpop.xlane.xlu0 %579 }
  0xef   : > { %v1233_v52 = vpop.eup %1232  ;;  %1246 = vrsqrt.f32 %v580_v34 }
  0xf0   : > { %v1235_v46 = vpop.eup %1234  ;;  %v748_v63 = vmul.f32 16.0, %v1233_v52 }
  0xf1   : > { %v481_v47 = vpop.xlane.xlu1 %480  ;;  %v716_v57 = vmul.f32 16.0, %v1235_v46 }
  0xf2   : > { %1248 = vrsqrt.f32 %v481_v47  ;;  %v478_v9 = vpop.xlane.xlu0 %477  ;;  %v859_v25 = vmul.f32 %v748_v63, %v1672_v1  ;;  %v858_v23 = vmul.f32 %v748_v63, %v1669_v0 }
  0xf3   : > { %v1237_v55 = vpop.eup %1236  ;;  %1250 = vrsqrt.f32 %v478_v9  ;;  %v795_v37 = vmul.f32 %v716_v57, %v1682_v5  ;;  %v794_v22 = vmul.f32 %v716_v57, %v1675_v2 }
  0xf4   : > { %v1239_v43 = vpop.eup %1238  ;;  %v749_v42 = vmul.f32 16.0, %v1237_v55 }
  0xf5   : > { %v577_v35 = vpop.xlane.xlu1 %576  ;;  %v717_v4 = vmul.f32 16.0, %v1239_v43 }
  0xf6   : > { %1252 = vrsqrt.f32 %v577_v35  ;;  %v574_v24 = vpop.xlane.xlu0 %573  ;;  %v861_v3 = vmul.f32 %v749_v42, %v1690_v8  ;;  %v860_v56 = vmul.f32 %v749_v42, %v1687_v7 }
  0xf7   : > { %v1241_v36 = vpop.eup %1240  ;;  %1254 = vrsqrt.f32 %v574_v24  ;;  %v797_v53 = vmul.f32 %v717_v4, %v1702_v13  ;;  %v796_v1 = vmul.f32 %v717_v4, %v1699_v12 }
  0xf8   : > { %v1243_v0 = vpop.eup %1242  ;;  %v715_v54 = vmul.f32 16.0, %v1241_v36  ;;  %v941_v17 = vpack.c.bf16 %v861_v3, %v859_v25  ;;  %v940_v6 = vpack.c.bf16 %v860_v56, %v858_v23 }
  0xf9   : > { %v714_v34 = vmul.f32 16.0, %v1243_v0  ;;  %v475_v5 = vpop.xlane.xlu1 %474  ;;  %v909_v52 = vpack.c.bf16 %v797_v53, %v795_v37  ;;  %v908_v8 = vpack.c.bf16 %v796_v1, %v794_v22 }
  0xfa   : > { %1256 = vrsqrt.f32 %v475_v5  ;;  %v472_v7 = vpop.xlane.xlu0 %471  ;;  %1007 = vmatprep.subr.bf16.mxu1 %v941_v17  ;;  %v793_v46 = vmul.f32 %v715_v54, %v1712_v18  ;;  %v792_v55 = vmul.f32 %v715_v54, %v1705_v14 }
  0xfb   : > { %v1245_v13 = vpop.eup %1244  ;;  %1258 = vrsqrt.f32 %v472_v7  ;;  %966 = vmatprep.subr.bf16.mxu0 %v909_v52  ;;  %1008 = vmatpush1.bf16.xpose.msra.mxu1 %v940_v6  ;;  %v791_v2 = vmul.f32 %v714_v34, %v1718_v20  ;;  %v790_v18 = vmul.f32 %v714_v34, %v1715_v19 }
  0xfc   : > { %v1247_v12 = vpop.eup %1246  ;;  %v747_v47 = vmul.f32 16.0, %v1245_v13  ;;  %967 = vmatpush1.bf16.xpose.msra.mxu0 %v908_v8 }
  0xfd   : > { %v746_v63 = vmul.f32 16.0, %v1247_v12  ;;  %v571_v9 = vpop.xlane.xlu1 %570  ;;  %v907_v57 = vpack.c.bf16 %v793_v46, %v791_v2 }
  0xfe   : > { %1260 = vrsqrt.f32 %v571_v9  ;;  %v568_v43 = vpop.xlane.xlu0 %567  ;;  %v857_v42 = vmul.f32 %v747_v47, %v1732_v29  ;;  %v856_v35 = vmul.f32 %v747_v47, %v1729_v28  ;;  %v906_v29 = vpack.c.bf16 %v792_v55, %v790_v18 }
  0xff   : > { %v1249_v4 = vpop.eup %1248  ;;  %1262 = vrsqrt.f32 %v568_v43  ;;  %968 = vmatprep.subr.bf16.mxu0 %v907_v57  ;;  %v855_v20 = vmul.f32 %v746_v63, %v1738_v31  ;;  %v854_v25 = vmul.f32 %v746_v63, %v1735_v30 }
 0x100   : > { %v1251_v23 = vpop.eup %1250  ;;  %v713_v21 = vmul.f32 16.0, %v1249_v4 }
 0x101   : > { %v712_v24 = vmul.f32 16.0, %v1251_v23  ;;  %v469_v37 = vpop.xlane.xlu1 %468  ;;  %v939_v14 = vpack.c.bf16 %v857_v42, %v855_v20  ;;  %v938_v3 = vpack.c.bf16 %v856_v35, %v854_v25 }
 0x102   : > { %1264 = vrsqrt.f32 %v469_v37  ;;  %v466_v56 = vpop.xlane.xlu0 %465  ;;  %v789_v19 = vmul.f32 %v713_v21, %v1752_v39  ;;  %v788_v0 = vmul.f32 %v713_v21, %v1749_v38 }
 0x103   : > { %v1253_v36 = vpop.eup %1252  ;;  %1266 = vrsqrt.f32 %v466_v56  ;;  %1009 = vmatprep.subr.bf16.mxu1 %v939_v14  ;;  %v787_v28 = vmul.f32 %v712_v24, %v1758_v41  ;;  %v786_v39 = vmul.f32 %v712_v24, %v1755_v40 }
 0x104   : > { %v1255_v53 = vpop.eup %1254  ;;  %v745_v31 = vmul.f32 16.0, %v1253_v36  ;;  %969 = vmatpush1.bf16.xpose.msra.mxu0 %v906_v29  ;;  %1010 = vmatpush1.bf16.xpose.msra.mxu1 %v938_v3 }
 0x105   : > { %v744_v30 = vmul.f32 16.0, %v1255_v53  ;;  %v565_v22 = vpop.xlane.xlu1 %564  ;;  %v905_v1 = vpack.c.bf16 %v789_v19, %v787_v28 }
 0x106   : > { %1268 = vrsqrt.f32 %v565_v22  ;;  %v562_v54 = vpop.xlane.xlu0 %561  ;;  %v853_v17 = vmul.f32 %v745_v31, %v1772_v49  ;;  %v852_v6 = vmul.f32 %v745_v31, %v1769_v48  ;;  %v904_v49 = vpack.c.bf16 %v788_v0, %v786_v39 }
 0x107   : > { %v1257_v34 = vpop.eup %1256  ;;  %1270 = vrsqrt.f32 %v562_v54  ;;  %970 = vmatprep.subr.bf16.mxu0 %v905_v1  ;;  %v851_v41 = vmul.f32 %v744_v30, %v1778_v51  ;;  %v850_v5 = vmul.f32 %v744_v30, %v1775_v50  ;;  %v2491_v30 = vld [vmem:[#allocation11_spill] sm:$0xff] }
 0x108   : > { %v1259_v52 = vpop.eup %1258  ;;  %v711_v8 = vmul.f32 16.0, %v1257_v34  ;;  %v2492_v34 = vld [vmem:[#allocation14_spill] sm:$0xff] }
 0x109   : > { %v710_v7 = vmul.f32 16.0, %v1259_v52  ;;  %v463_v46 = vpop.xlane.xlu1 %462  ;;  %v937_v38 = vpack.c.bf16 %v853_v17, %v851_v41  ;;  %v936_v13 = vpack.c.bf16 %v852_v6, %v850_v5 }
 0x10a   : > { %1272 = vrsqrt.f32 %v463_v46  ;;  %v460_v2 = vpop.xlane.xlu0 %459  ;;  %v785_v40 = vmul.f32 %v711_v8, %v1792_v59  ;;  %v784_v57 = vmul.f32 %v711_v8, %v1789_v58 }
 0x10b   : > { %v1261_v12 = vpop.eup %1260  ;;  %1274 = vrsqrt.f32 %v460_v2  ;;  %1011 = vmatprep.subr.bf16.mxu1 %v937_v38  ;;  %v783_v48 = vmul.f32 %v710_v7, %v1798_v61  ;;  %v782_v59 = vmul.f32 %v710_v7, %v1795_v60 }
 0x10c   : > { %v1263_v47 = vpop.eup %1262  ;;  %v743_v51 = vmul.f32 16.0, %v1261_v12  ;;  %971 = vmatpush1.bf16.xpose.msra.mxu0 %v904_v49  ;;  %1012 = vmatpush1.bf16.xpose.msra.mxu1 %v936_v13  ;;  %v2494_v13 = vld [vmem:[#allocation13_spill] sm:$0xff] }
 0x10d   : > { %v742_v50 = vmul.f32 16.0, %v1263_v47  ;;  %v559_v63 = vpop.xlane.xlu1 %558  ;;  %v903_v9 = vpack.c.bf16 %v785_v40, %v783_v48  ;;  %v2495_v40 = vld [vmem:[#allocation18_spill] sm:$0xff]  ;;  %v2496_v48 = vld [vmem:[#allocation15_spill] sm:$0xff] }
 0x10e   : > { %1276 = vrsqrt.f32 %v559_v63  ;;  %v556_v55 = vpop.xlane.xlu0 %555  ;;  %v849_v43 = vmul.f32 %v743_v51, %v1812_v11  ;;  %v848_v42 = vmul.f32 %v743_v51, %v1809_v10  ;;  %v902_v11 = vpack.c.bf16 %v784_v57, %v782_v59  ;;  %v2497_v51 = vld [vmem:[#allocation17_spill] sm:$0xff] }
 0x10f   : > { %v1265_v18 = vpop.eup %1264  ;;  %1278 = vrsqrt.f32 %v556_v55  ;;  %972 = vmatprep.subr.bf16.mxu0 %v903_v9  ;;  %v847_v61 = vmul.f32 %v742_v50, %v1818_v16  ;;  %v846_v35 = vmul.f32 %v742_v50, %v1815_v15  ;;  %v2498_v9 = vld [vmem:[#allocation20_spill] sm:$0xff]  ;;  %v2499_v55 = vld [vmem:[#allocation19_spill] sm:$0xff] }
 0x110   : > { %v1267_v4 = vpop.eup %1266  ;;  %v709_v20 = vmul.f32 16.0, %v1265_v18 }
 0x111   : > { %v708_v25 = vmul.f32 16.0, %v1267_v4  ;;  %v457_v23 = vpop.xlane.xlu1 %456  ;;  %v935_v58 = vpack.c.bf16 %v849_v43, %v847_v61  ;;  %v934_v21 = vpack.c.bf16 %v848_v42, %v846_v35 }
 0x112   : > { %1280 = vrsqrt.f32 %v457_v23  ;;  %v454_v24 = vpop.xlane.xlu0 %453  ;;  %v781_v60 = vmul.f32 %v709_v20, %v1832_v27  ;;  %v780_v29 = vmul.f32 %v709_v20, %v1829_v26  ;;  %v2500_v23 = vld [vmem:[#allocation22_spill] sm:$0xff] }
 0x113   : > { %v1269_v37 = vpop.eup %1268  ;;  %1282 = vrsqrt.f32 %v454_v24  ;;  %1013 = vmatprep.subr.bf16.mxu1 %v935_v58  ;;  %v779_v10 = vmul.f32 %v708_v25, %v1838_v33  ;;  %v778_v27 = vmul.f32 %v708_v25, %v1835_v32  ;;  %v2490_v33 = vld [vmem:[#allocation12_spill] sm:$0xff] }
 0x114   : > { %v1271_v14 = vpop.eup %1270  ;;  %v741_v16 = vmul.f32 16.0, %v1269_v37  ;;  %973 = vmatpush1.bf16.xpose.msra.mxu0 %v902_v11  ;;  %1014 = vmatpush1.bf16.xpose.msra.mxu1 %v934_v21  ;;  %v2501_v24 = vld [vmem:[#allocation24_spill] sm:$0xff] }
 0x115   : > { %v740_v15 = vmul.f32 16.0, %v1271_v14  ;;  %v553_v3 = vpop.xlane.xlu1 %552  ;;  %v901_v56 = vpack.c.bf16 %v781_v60, %v779_v10 }
 0x116   : > { %1284 = vrsqrt.f32 %v553_v3  ;;  %v550_v19 = vpop.xlane.xlu0 %549  ;;  %v845_v36 = vmul.f32 %v741_v16, %v1852_v45  ;;  %v844_v28 = vmul.f32 %v741_v16, %v1849_v44  ;;  %v900_v45 = vpack.c.bf16 %v780_v29, %v778_v27  ;;  %v2493_v44 = vld [vmem:[#allocation16_spill] sm:$0xff]  ;;  %v2503_v29 = vld [vmem:[#allocation26_spill] sm:$0xff] }
 0x117   : > { %v1273_v53 = vpop.eup %1272  ;;  %1286 = vrsqrt.f32 %v550_v19  ;;  %974 = vmatprep.subr.bf16.mxu0 %v901_v56  ;;  %v843_v31 = vmul.f32 %v740_v15, %v2490_v33  ;;  %v842_v22 = vmul.f32 %v740_v15, %v2491_v30  ;;  %v2502_v15 = vld [vmem:[#allocation21_spill] sm:$0xff] }
 0x118   : > { %v1275_v1 = vpop.eup %1274  ;;  %v707_v0 = vmul.f32 16.0, %v1273_v53 }
 0x119   : > { %v706_v54 = vmul.f32 16.0, %v1275_v1  ;;  %v451_v17 = vpop.xlane.xlu1 %450  ;;  %v933_v26 = vpack.c.bf16 %v845_v36, %v843_v31  ;;  %v932_v39 = vpack.c.bf16 %v844_v28, %v842_v22  ;;  %v2504_v36 = vld [vmem:[#allocation23_spill] sm:$0xff]  ;;  %v2505_v28 = vld [vmem:[#allocation25_spill] sm:$0xff]  ;;  %v2506_v31 = vld [vmem:[#allocation28_spill] sm:$0xff] }
 0x11a   : > { %1288 = vrsqrt.f32 %v451_v17  ;;  %v448_v6 = vpop.xlane.xlu0 %447  ;;  %v777_v32 = vmul.f32 %v707_v0, %v2492_v34  ;;  %v776_v2 = vmul.f32 %v707_v0, %v2494_v13  ;;  %v2507_v22 = vld [vmem:[#allocation27_spill] sm:$0xff] }
 0x11b   : > { %v1277_v41 = vpop.eup %1276  ;;  %1290 = vrsqrt.f32 %v448_v6  ;;  %1015 = vmatprep.subr.bf16.mxu1 %v933_v26  ;;  %v775_v5 = vmul.f32 %v706_v54, %v2493_v44  ;;  %v774_v47 = vmul.f32 %v706_v54, %v2496_v48 }
 0x11c   : > { %v1279_v52 = vpop.eup %1278  ;;  %v739_v8 = vmul.f32 16.0, %v1277_v41  ;;  %975 = vmatpush1.bf16.xpose.msra.mxu0 %v900_v45  ;;  %1016 = vmatpush1.bf16.xpose.msra.mxu1 %v932_v39 }
 0x11d   : > { %v738_v7 = vmul.f32 16.0, %v1279_v52  ;;  %v547_v46 = vpop.xlane.xlu1 %546  ;;  %v899_v38 = vpack.c.bf16 %v777_v32, %v775_v5  ;;  %v898_v25 = vpack.c.bf16 %v776_v2, %v774_v47  ;;  %v2508_v32 = vld [vmem:[#allocation30_spill] sm:$0xff]  ;;  %v2509_v5 = vld [vmem:[#allocation32_spill] sm:$0xff]  ;;  %v2510_v2 = vld [vmem:[#allocation29_spill] sm:$0xff] }
 0x11e   : > { %1292 = vrsqrt.f32 %v547_v46  ;;  %v544_v49 = vpop.xlane.xlu0 %543  ;;  %v841_v12 = vmul.f32 %v739_v8, %v2495_v40  ;;  %v840_v50 = vmul.f32 %v739_v8, %v2497_v51  ;;  %v2512_v47 = vld [vmem:[#allocation31_spill] sm:$0xff] }
 0x11f   : > { %v1281_v63 = vpop.eup %1280  ;;  %1294 = vrsqrt.f32 %v544_v49  ;;  %976 = vmatprep.subr.bf16.mxu0 %v899_v38  ;;  %v839_v57 = vmul.f32 %v738_v7, %v2498_v9  ;;  %v838_v43 = vmul.f32 %v738_v7, %v2499_v55 }
 0x120   : > { %v1283_v59 = vpop.eup %1282  ;;  %v705_v42 = vmul.f32 16.0, %v1281_v63 }
 0x121   : > { %v704_v18 = vmul.f32 16.0, %v1283_v59  ;;  %v541_v61 = vpop.xlane.xlu1 %540  ;;  %v931_v35 = vpack.c.bf16 %v841_v12, %v839_v57  ;;  %v930_v4 = vpack.c.bf16 %v840_v50, %v838_v43  ;;  %v2511_v12 = vld [vmem:[#allocation34_spill] sm:$0xff]  ;;  %v2513_v50 = vld [vmem:[#allocation33_spill] sm:$0xff]  ;;  %v2514_v57 = vld [vmem:[#allocation36_spill] sm:$0xff] }
 0x122   : > { %1296 = vrsqrt.f32 %v541_v61  ;;  %v538_v20 = vpop.xlane.xlu0 %537  ;;  %v773_v58 = vmul.f32 %v705_v42, %v2500_v23  ;;  %v772_v3 = vmul.f32 %v705_v42, %v2502_v15  ;;  %v2515_v43 = vld [vmem:[#allocation35_spill] sm:$0xff] }
 0x123   : > { %v1285_v21 = vpop.eup %1284  ;;  %1298 = vrsqrt.f32 %v538_v20  ;;  %1017 = vmatprep.subr.bf16.mxu1 %v931_v35  ;;  %v771_v11 = vmul.f32 %v704_v18, %v2501_v24  ;;  %v770_v27 = vmul.f32 %v704_v18, %v2504_v36 }
 0x124   : > { %v1287_v60 = vpop.eup %1286  ;;  %v737_v37 = vmul.f32 16.0, %v1285_v21  ;;  %977 = vmatpush1.bf16.xpose.msra.mxu0 %v898_v25  ;;  %1018 = vmatpush1.bf16.xpose.msra.mxu1 %v930_v4 }
 0x125   : > { %v736_v10 = vmul.f32 16.0, %v1287_v60  ;;  %v637_v14 = vpop.xlane.xlu1 %636  ;;  %v897_v16 = vpack.c.bf16 %v773_v58, %v771_v11  ;;  %v896_v34 = vpack.c.bf16 %v772_v3, %v770_v27  ;;  %v2516_v58 = vld [vmem:[#allocation38_spill] sm:$0xff]  ;;  %v2517_v11 = vld [vmem:[#allocation40_spill] sm:$0xff]  ;;  %v2518_v3 = vld [vmem:[#allocation37_spill] sm:$0xff] }
 0x126   : > { %1300 = vrsqrt.f32 %v637_v14  ;;  %v634_v56 = vpop.xlane.xlu0 %633  ;;  %v837_v19 = vmul.f32 %v737_v37, %v2503_v29  ;;  %v836_v53 = vmul.f32 %v737_v37, %v2505_v28  ;;  %v2520_v27 = vld [vmem:[#allocation39_spill] sm:$0xff] }
 0x127   : > { %v1289_v33 = vpop.eup %1288  ;;  %1302 = vrsqrt.f32 %v634_v56  ;;  %978 = vmatprep.subr.bf16.mxu0 %v897_v16  ;;  %v835_v30 = vmul.f32 %v736_v10, %v2506_v31  ;;  %v834_v1 = vmul.f32 %v736_v10, %v2507_v22 }
 0x128   : > { %v1291_v0 = vpop.eup %1290  ;;  %v703_v54 = vmul.f32 16.0, %v1289_v33 }
 0x129   : > { %v702_v17 = vmul.f32 16.0, %v1291_v0  ;;  %v535_v26 = vpop.xlane.xlu1 %534  ;;  %v929_v39 = vpack.c.bf16 %v837_v19, %v835_v30  ;;  %v928_v6 = vpack.c.bf16 %v836_v53, %v834_v1  ;;  %v2519_v19 = vld [vmem:[#allocation42_spill] sm:$0xff]  ;;  %v2521_v53 = vld [vmem:[#allocation41_spill] sm:$0xff]  ;;  %v2522_v30 = vld [vmem:[#allocation44_spill] sm:$0xff] }
 0x12a   : > { %1304 = vrsqrt.f32 %v535_v26  ;;  %v532_v45 = vpop.xlane.xlu0 %531  ;;  %v769_v41 = vmul.f32 %v703_v54, %v2508_v32  ;;  %v768_v49 = vmul.f32 %v703_v54, %v2510_v2  ;;  %v2523_v1 = vld [vmem:[#allocation43_spill] sm:$0xff] }
 0x12b   : > { %v1293_v44 = vpop.eup %1292  ;;  %1306 = vrsqrt.f32 %v532_v45  ;;  %1019 = vmatprep.subr.bf16.mxu1 %v929_v39  ;;  %v767_v52 = vmul.f32 %v702_v17, %v2509_v5  ;;  %v766_v51 = vmul.f32 %v702_v17, %v2512_v47 }
 0x12c   : > { %v1295_v8 = vpop.eup %1294  ;;  %v735_v7 = vmul.f32 16.0, %v1293_v44  ;;  %979 = vmatpush1.bf16.xpose.msra.mxu0 %v896_v34  ;;  %1020 = vmatpush1.bf16.xpose.msra.mxu1 %v928_v6 }
 0x12d   : > { %v734_v46 = vmul.f32 16.0, %v1295_v8  ;;  %v631_v38 = vpop.xlane.xlu1 %630  ;;  %v895_v13 = vpack.c.bf16 %v769_v41, %v767_v52  ;;  %v894_v23 = vpack.c.bf16 %v768_v49, %v766_v51  ;;  %v2524_v41 = vld [vmem:[#allocation46_spill] sm:$0xff]  ;;  %v2525_v52 = vld [vmem:[#allocation48_spill] sm:$0xff]  ;;  %v2526_v49 = vld [vmem:[#allocation45_spill] sm:$0xff] }
 0x12e   : > { %1308 = vrsqrt.f32 %v631_v38  ;;  %v628_v40 = vpop.xlane.xlu0 %627  ;;  %v833_v48 = vmul.f32 %v735_v7, %v2511_v12  ;;  %v832_v63 = vmul.f32 %v735_v7, %v2513_v50  ;;  %v2528_v51 = vld [vmem:[#allocation47_spill] sm:$0xff] }
 0x12f   : > { %v1297_v9 = vpop.eup %1296  ;;  %1310 = vrsqrt.f32 %v628_v40  ;;  %980 = vmatprep.subr.bf16.mxu0 %v895_v13  ;;  %v831_v55 = vmul.f32 %v734_v46, %v2514_v57  ;;  %v830_v59 = vmul.f32 %v734_v46, %v2515_v43 }
 0x130   : > { %v1299_v42 = vpop.eup %1298  ;;  %v733_v18 = vmul.f32 16.0, %v1297_v9 }
 0x131   : > { %v732_v61 = vmul.f32 16.0, %v1299_v42  ;;  %v529_v35 = vpop.xlane.xlu1 %528  ;;  %v927_v4 = vpack.c.bf16 %v833_v48, %v831_v55  ;;  %v926_v20 = vpack.c.bf16 %v832_v63, %v830_v59  ;;  %v2527_v48 = vld [vmem:[#allocation50_spill] sm:$0xff]  ;;  %v2529_v63 = vld [vmem:[#allocation49_spill] sm:$0xff]  ;;  %v2530_v55 = vld [vmem:[#allocation52_spill] sm:$0xff] }
 0x132   : > { %1312 = vrsqrt.f32 %v529_v35  ;;  %v526_v25 = vpop.xlane.xlu0 %525  ;;  %v829_v21 = vmul.f32 %v733_v18, %v2516_v58  ;;  %v828_v56 = vmul.f32 %v733_v18, %v2518_v3  ;;  %v2531_v59 = vld [vmem:[#allocation51_spill] sm:$0xff] }
 0x133   : > { %v1301_v24 = vpop.eup %1300  ;;  %1314 = vrsqrt.f32 %v526_v25  ;;  %1021 = vmatprep.subr.bf16.mxu1 %v927_v4  ;;  %v827_v60 = vmul.f32 %v732_v61, %v2517_v11  ;;  %v826_v28 = vmul.f32 %v732_v61, %v2520_v27 }
 0x134   : > { %v1303_v37 = vpop.eup %1302  ;;  %v765_v10 = vmul.f32 16.0, %v1301_v24  ;;  %981 = vmatpush1.bf16.xpose.msra.mxu0 %v894_v23  ;;  %1022 = vmatpush1.bf16.xpose.msra.mxu1 %v926_v20 }
 0x135   : > { %v764_v14 = vmul.f32 16.0, %v1303_v37  ;;  %v625_v16 = vpop.xlane.xlu1 %624  ;;  %v925_v15 = vpack.c.bf16 %v829_v21, %v827_v60  ;;  %v924_v32 = vpack.c.bf16 %v828_v56, %v826_v28  ;;  %v2532_v21 = vld [vmem:[#allocation54_spill] sm:$0xff]  ;;  %v2533_v60 = vld [vmem:[#allocation56_spill] sm:$0xff]  ;;  %v2534_v56 = vld [vmem:[#allocation53_spill] sm:$0xff] }
 0x136   : > { %1316 = vrsqrt.f32 %v625_v16  ;;  %v622_v29 = vpop.xlane.xlu0 %621  ;;  %v893_v36 = vmul.f32 %v765_v10, %v2519_v19  ;;  %v892_v33 = vmul.f32 %v765_v10, %v2521_v53  ;;  %v2536_v28 = vld [vmem:[#allocation55_spill] sm:$0xff] }
 0x137   : > { %v1305_v31 = vpop.eup %1304  ;;  %1318 = vrsqrt.f32 %v622_v29  ;;  %982 = vmatprep.subr.bf16.mxu0 %v925_v15  ;;  %v891_v22 = vmul.f32 %v764_v14, %v2522_v30  ;;  %v890_v0 = vmul.f32 %v764_v14, %v2523_v1 }
 0x138   : > { %v1307_v54 = vpop.eup %1306  ;;  %v731_v17 = vmul.f32 16.0, %v1305_v31 }
 0x139   : > { %v730_v26 = vmul.f32 16.0, %v1307_v54  ;;  %v523_v39 = vpop.xlane.xlu1 %522  ;;  %v957_v6 = vpack.c.bf16 %v893_v36, %v891_v22  ;;  %v956_v45 = vpack.c.bf16 %v892_v33, %v890_v0  ;;  %v2535_v36 = vld [vmem:[#allocation58_spill] sm:$0xff]  ;;  %v2537_v33 = vld [vmem:[#allocation57_spill] sm:$0xff]  ;;  %v2538_v22 = vld [vmem:[#allocation60_spill] sm:$0xff] }
 0x13a   : > { %1320 = vrsqrt.f32 %v523_v39  ;;  %v520_v34 = vpop.xlane.xlu0 %519  ;;  %v825_v44 = vmul.f32 %v731_v17, %v2524_v41  ;;  %v824_v40 = vmul.f32 %v731_v17, %v2526_v49  ;;  %v2539_v0 = vld [vmem:[#allocation59_spill] sm:$0xff] }
 0x13b   : > { %v1309_v5 = vpop.eup %1308  ;;  %1322 = vrsqrt.f32 %v520_v34  ;;  %1023 = vmatprep.subr.bf16.mxu1 %v957_v6  ;;  %v823_v8 = vmul.f32 %v730_v26, %v2525_v52  ;;  %v822_v50 = vmul.f32 %v730_v26, %v2528_v51 }
 0x13c   : > { %v1311_v7 = vpop.eup %1310  ;;  %v763_v46 = vmul.f32 16.0, %v1309_v5  ;;  %983 = vmatpush2.bf16.xpose.msra.mxu0 %v924_v32  ;;  %1024 = vmatpush2.bf16.xpose.msra.mxu1 %v956_v45 }
 0x13d   : > { %v762_v38 = vmul.f32 16.0, %v1311_v7  ;;  %v619_v13 = vpop.xlane.xlu1 %618  ;;  %v923_v2 = vpack.c.bf16 %v825_v44, %v823_v8  ;;  %v922_v58 = vpack.c.bf16 %v824_v40, %v822_v50  ;;  %v2540_v44 = vld [vmem:[#allocation61_spill] sm:$0xff]  ;;  %v2541_v8 = vld [vmem:[#allocation62_spill] sm:$0xff]  ;;  %v1361_v50 = vld [vmem:[%s1662_s5 + $0x180] sm:$0xff] }
 0x13e   : > { %1324 = vrsqrt.f32 %v619_v13  ;;  %v616_v12 = vpop.xlane.xlu0 %615  ;;  %v889_v47 = vmul.f32 %v763_v46, %v2527_v48  ;;  %v888_v9 = vmul.f32 %v763_v46, %v2529_v63  ;;  %v1360_v40 = vld [vmem:[%s1662_s5 + $0x190] sm:$0xff] }
 0x13f   : > { %v1313_v57 = vpop.eup %1312  ;;  %1326 = vrsqrt.f32 %v616_v12  ;;  %984 = vmatprep.subr.bf16.mxu0 %v923_v2  ;;  %v887_v43 = vmul.f32 %v762_v38, %v2530_v55  ;;  %v886_v42 = vmul.f32 %v762_v38, %v2531_v59 }
 0x140   : > { %v1315_v18 = vpop.eup %1314  ;;  %v729_v61 = vmul.f32 16.0, %v1313_v57 }
 0x141   : > { %v728_v35 = vmul.f32 16.0, %v1315_v18  ;;  %v517_v4 = vpop.xlane.xlu1 %516  ;;  %v955_v20 = vpack.c.bf16 %v889_v47, %v887_v43  ;;  %v954_v25 = vpack.c.bf16 %v888_v9, %v886_v42  ;;  %v2542_v47 = vld [vmem:[#allocation64_spill] sm:$0xff]  ;;  %v2543_v9 = vld [vmem:[#allocation63_spill] sm:$0xff]  ;;  %v2544_v43 = vld [vmem:[#allocation66_spill] sm:$0xff] }
 0x142   : > { %1328 = vrsqrt.f32 %v517_v4  ;;  %v514_v23 = vpop.xlane.xlu0 %513  ;;  %v821_v24 = vmul.f32 %v729_v61, %v2532_v21  ;;  %v820_v29 = vmul.f32 %v729_v61, %v2534_v56  ;;  %v2545_v42 = vld [vmem:[#allocation65_spill] sm:$0xff] }
 0x143   : > { %v1317_v11 = vpop.eup %1316  ;;  %1330 = vrsqrt.f32 %v514_v23  ;;  %1025 = vmatprep.subr.bf16.mxu1 %v955_v20  ;;  %v819_v37 = vmul.f32 %v728_v35, %v2533_v60  ;;  %v818_v53 = vmul.f32 %v728_v35, %v2536_v28 }
 0x144   : > { %v1319_v10 = vpop.eup %1318  ;;  %v761_v14 = vmul.f32 16.0, %v1317_v11  ;;  %985 = vmatpush2.bf16.xpose.msra.mxu0 %v922_v58  ;;  %1026 = vmatpush2.bf16.xpose.msra.mxu1 %v954_v25 }
 0x145   : > { %v760_v16 = vmul.f32 16.0, %v1319_v10  ;;  %v613_v15 = vpop.xlane.xlu1 %612  ;;  %v921_v3 = vpack.c.bf16 %v821_v24, %v819_v37  ;;  %v920_v41 = vpack.c.bf16 %v820_v29, %v818_v53  ;;  %v2546_v24 = vld [vmem:[#allocation67_spill] sm:$0xff]  ;;  %v2547_v37 = vld [vmem:[#allocation68_spill] sm:$0xff]  ;;  %v1362_v29 = vld [vmem:[%s1662_s5 + $0x170] sm:$0xff] }
 0x146   : > { %1332 = vrsqrt.f32 %v613_v15  ;;  %v610_v19 = vpop.xlane.xlu0 %609  ;;  %v885_v27 = vmul.f32 %v761_v14, %v2535_v36  ;;  %v884_v31 = vmul.f32 %v761_v14, %v2537_v33  ;;  %v1364_v53 = vld [vmem:[%s1662_s5 + $0x160] sm:$0xff] }
 0x147   : > { %v1321_v30 = vpop.eup %1320  ;;  %1334 = vrsqrt.f32 %v610_v19  ;;  %986 = vmatprep.subr.bf16.mxu0 %v921_v3  ;;  %v883_v1 = vmul.f32 %v760_v16, %v2538_v22  ;;  %v882_v54 = vmul.f32 %v760_v16, %v2539_v0 }
 0x148   : > { %v1323_v17 = vpop.eup %1322  ;;  %v727_v26 = vmul.f32 16.0, %v1321_v30 }
 0x149   : > { %v726_v39 = vmul.f32 16.0, %v1323_v17  ;;  %v511_v6 = vpop.xlane.xlu1 %510  ;;  %v953_v45 = vpack.c.bf16 %v885_v27, %v883_v1  ;;  %v952_v34 = vpack.c.bf16 %v884_v31, %v882_v54  ;;  %v1363_v27 = vld [vmem:[%s1662_s5 + $0x378] sm:$0xff]  ;;  %v1365_v31 = vld [vmem:[%s1662_s5 + $0x370] sm:$0xff]  ;;  %v1366_v1 = vld [vmem:[%s1662_s5 + $0x368] sm:$0xff] }
 0x14a   : > { %1336 = vrsqrt.f32 %v511_v6  ;;  %v508_v32 = vpop.xlane.xlu0 %507  ;;  %v817_v5 = vmul.f32 %v727_v26, %v2540_v44  ;;  %v816_v12 = vmul.f32 %v1360_v40, %v727_v26  ;;  %v1367_v54 = vld [vmem:[%s1662_s5 + $0x360] sm:$0xff] }
 0x14b   : > { %v1325_v52 = vpop.eup %1324  ;;  %1338 = vrsqrt.f32 %v508_v32  ;;  %1027 = vmatprep.subr.bf16.mxu1 %v953_v45  ;;  %v815_v7 = vmul.f32 %v726_v39, %v2541_v8  ;;  %v814_v63 = vmul.f32 %v1361_v50, %v726_v39 }
 0x14c   : > { %v1327_v46 = vpop.eup %1326  ;;  %v759_v38 = vmul.f32 16.0, %v1325_v52  ;;  %987 = vmatpush2.bf16.xpose.msra.mxu0 %v920_v41  ;;  %1028 = vmatpush2.bf16.xpose.msra.mxu1 %v952_v34 }
 0x14d   : > { %v758_v13 = vmul.f32 16.0, %v1327_v46  ;;  %v607_v2 = vpop.xlane.xlu1 %606  ;;  %v919_v49 = vpack.c.bf16 %v817_v5, %v815_v7  ;;  %v918_v21 = vpack.c.bf16 %v816_v12, %v814_v63  ;;  %v1368_v5 = vld [vmem:[%s1662_s5 + $0x158] sm:$0xff]  ;;  %v1369_v7 = vld [vmem:[%s1662_s5 + $0x148] sm:$0xff]  ;;  %v1370_v12 = vld [vmem:[%s1662_s5 + $0x150] sm:$0xff] }
 0x14e   : > { %1340 = vrsqrt.f32 %v607_v2  ;;  %v604_v48 = vpop.xlane.xlu0 %603  ;;  %v881_v51 = vmul.f32 %v759_v38, %v2542_v47  ;;  %v880_v57 = vmul.f32 %v759_v38, %v2543_v9  ;;  %v1372_v63 = vld [vmem:[%s1662_s5 + $0x140] sm:$0xff] }
 0x14f   : > { %v1329_v55 = vpop.eup %1328  ;;  %1342 = vrsqrt.f32 %v604_v48  ;;  %988 = vmatprep.subr.bf16.mxu0 %v919_v49  ;;  %v879_v59 = vmul.f32 %v758_v13, %v2544_v43  ;;  %v878_v18 = vmul.f32 %v758_v13, %v2545_v42 }
 0x150   : > { %v1331_v61 = vpop.eup %1330  ;;  %v725_v35 = vmul.f32 16.0, %v1329_v55 }
 0x151   : > { %v724_v4 = vmul.f32 16.0, %v1331_v61  ;;  %v505_v20 = vpop.xlane.xlu1 %504  ;;  %v951_v25 = vpack.c.bf16 %v881_v51, %v879_v59  ;;  %v950_v23 = vpack.c.bf16 %v880_v57, %v878_v18  ;;  %v1371_v51 = vld [vmem:[%s1662_s5 + $0x358] sm:$0xff]  ;;  %v1373_v57 = vld [vmem:[%s1662_s5 + $0x350] sm:$0xff]  ;;  %v1374_v59 = vld [vmem:[%s1662_s5 + $0x348] sm:$0xff] }
 0x152   : > { %1344 = vrsqrt.f32 %v505_v20  ;;  %v502_v58 = vpop.xlane.xlu0 %501  ;;  %v813_v11 = vmul.f32 %v725_v35, %v2546_v24  ;;  %v812_v19 = vmul.f32 %v1362_v29, %v725_v35  ;;  %v1375_v18 = vld [vmem:[%s1662_s5 + $0x340] sm:$0xff] }
 0x153   : > { %v1333_v60 = vpop.eup %1332  ;;  %1346 = vrsqrt.f32 %v502_v58  ;;  %1029 = vmatprep.subr.bf16.mxu1 %v951_v25  ;;  %v811_v10 = vmul.f32 %v724_v4, %v2547_v37  ;;  %v810_v33 = vmul.f32 %v1364_v53, %v724_v4  ;;  %v1379_v29 = vld [vmem:[%s1662_s5 + $0x120] sm:$0xff] }
 0x154   : > { %v1335_v14 = vpop.eup %1334  ;;  %v757_v16 = vmul.f32 16.0, %v1333_v60  ;;  %989 = vmatpush2.bf16.xpose.msra.mxu0 %v918_v21  ;;  %1030 = vmatpush2.bf16.xpose.msra.mxu1 %v950_v23  ;;  %v1376_v21 = vld [vmem:[%s1662_s5 + $0x138] sm:$0xff]  ;;  %v1377_v60 = vld [vmem:[%s1662_s5 + $0x128] sm:$0xff] }
 0x155   : > { %v756_v15 = vmul.f32 16.0, %v1335_v14  ;;  %v601_v3 = vpop.xlane.xlu1 %600  ;;  %v917_v56 = vpack.c.bf16 %v813_v11, %v811_v10  ;;  %v916_v44 = vpack.c.bf16 %v812_v19, %v810_v33 }
 0x156   : > { %1348 = vrsqrt.f32 %v601_v3  ;;  %v598_v36 = vpop.xlane.xlu0 %597  ;;  %v877_v28 = vmul.f32 %v1363_v27, %v757_v16  ;;  %v876_v30 = vmul.f32 %v1365_v31, %v757_v16  ;;  %v1378_v3 = vld [vmem:[%s1662_s5 + $0x338] sm:$0xff]  ;;  %v1382_v31 = vld [vmem:[%s1662_s5 + $0x328] sm:$0xff] }
 0x157   : > { %v1337_v22 = vpop.eup %1336  ;;  %1350 = vrsqrt.f32 %v598_v36  ;;  %990 = vmatprep.subr.bf16.mxu0 %v917_v56  ;;  %v875_v0 = vmul.f32 %v1366_v1, %v756_v15  ;;  %v874_v17 = vmul.f32 %v1367_v54, %v756_v15  ;;  %v1380_v36 = vld [vmem:[%s1662_s5 + $0x130] sm:$0xff] }
 0x158   : > { %v1339_v26 = vpop.eup %1338  ;;  %v723_v39 = vmul.f32 16.0, %v1337_v22  ;;  %v1383_v22 = vld [vmem:[%s1662_s5 + $0x320] sm:$0xff] }
 0x159   : > { %v722_v6 = vmul.f32 16.0, %v1339_v26  ;;  %v499_v45 = vpop.xlane.xlu1 %498  ;;  %v949_v34 = vpack.c.bf16 %v877_v28, %v875_v0  ;;  %v948_v32 = vpack.c.bf16 %v876_v30, %v874_v17  ;;  %v1381_v28 = vld [vmem:[%s1662_s5 + $0x330] sm:$0xff] }
 0x15a   : > { %1352 = vrsqrt.f32 %v499_v45  ;;  %v496_v41 = vpop.xlane.xlu0 %495  ;;  %v809_v52 = vmul.f32 %v1368_v5, %v723_v39  ;;  %v808_v48 = vmul.f32 %v1370_v12, %v723_v39  ;;  %v1384_v45 = vld [vmem:[%s1662_s5 + $0x118] sm:$0xff]  ;;  %v1389_v12 = vld [vmem:[%s1662_s5 + $0x110] sm:$0xff] }
 0x15b   : > { %v1341_v8 = vpop.eup %1340  ;;  %1354 = vrsqrt.f32 %v496_v41  ;;  %1031 = vmatprep.subr.bf16.mxu1 %v949_v34  ;;  %v807_v46 = vmul.f32 %v1369_v7, %v722_v6  ;;  %v806_v9 = vmul.f32 %v1372_v63, %v722_v6  ;;  %v1385_v41 = vld [vmem:[%s1662_s5 + $0x108] sm:$0xff] }
 0x15c   : > { %v1343_v38 = vpop.eup %1342  ;;  %v755_v13 = vmul.f32 16.0, %v1341_v8  ;;  %991 = vmatpush2.bf16.xpose.msra.mxu0 %v916_v44  ;;  %1032 = vmatpush2.bf16.xpose.msra.mxu1 %v948_v32 }
 0x15d   : > { %v754_v2 = vmul.f32 16.0, %v1343_v38  ;;  %v595_v49 = vpop.xlane.xlu1 %594  ;;  %v915_v40 = vpack.c.bf16 %v809_v52, %v807_v46  ;;  %v914_v58 = vpack.c.bf16 %v808_v48, %v806_v9  ;;  %v1386_v46 = vld [vmem:[%s1662_s5 + $0x310] sm:$0xff] }
 0x15e   : > { %1356 = vrsqrt.f32 %v595_v49  ;;  %v592_v47 = vpop.xlane.xlu0 %591  ;;  %v873_v50 = vmul.f32 %v1371_v51, %v755_v13  ;;  %v872_v55 = vmul.f32 %v1373_v57, %v755_v13  ;;  %v1387_v13 = vld [vmem:[%s1662_s5 + $0x318] sm:$0xff]  ;;  %v1388_v49 = vld [vmem:[%s1662_s5 + $0x100] sm:$0xff] }
 0x15f   : > { %v1345_v43 = vpop.eup %1344  ;;  %1358 = vrsqrt.f32 %v592_v47  ;;  %992 = vmatprep.subr.bf16.mxu0 %v915_v40  ;;  %v871_v42 = vmul.f32 %v1374_v59, %v754_v2  ;;  %v870_v61 = vmul.f32 %v1375_v18, %v754_v2  ;;  %v1390_v47 = vld [vmem:[%s1662_s5 + $0x300] sm:$0xff] }
 0x160   : > { %v1347_v35 = vpop.eup %1346  ;;  %v721_v4 = vmul.f32 16.0, %v1345_v43  ;;  %v1166_v43 = vcombine.low %v2180_v62, %v2180_v62 }
 0x161   : > { %v720_v20 = vmul.f32 16.0, %v1347_v35  ;;  %v947_v25 = vpack.c.bf16 %v873_v50, %v871_v42  ;;  %v946_v23 = vpack.c.bf16 %v872_v55, %v870_v61  ;;  %v1391_v50 = vld [vmem:[%s1662_s5 + $0x308] sm:$0xff] }
 0x162   : > { %v805_v24 = vmul.f32 %v1376_v21, %v721_v4  ;;  %v804_v27 = vmul.f32 %v1380_v36, %v721_v4 }
 0x163   : > { %v1349_v11 = vpop.eup %1348  ;;  %1033 = vmatprep.subr.bf16.mxu1 %v947_v25  ;;  %v803_v37 = vmul.f32 %v1377_v60, %v720_v20  ;;  %v802_v19 = vmul.f32 %v1379_v29, %v720_v20 }
 0x164   : > { %v1351_v10 = vpop.eup %1350  ;;  %v753_v14 = vmul.f32 16.0, %v1349_v11  ;;  %993 = vmatpush2.bf16.xpose.msra.mxu0 %v914_v58  ;;  %1034 = vmatpush2.bf16.xpose.msra.mxu1 %v946_v23 }
 0x165   : > { %v752_v16 = vmul.f32 16.0, %v1351_v10  ;;  %v913_v15 = vpack.c.bf16 %v805_v24, %v803_v37  ;;  %v912_v6 = vpack.c.bf16 %v804_v27, %v802_v19 }
 0x166   : > { %v869_v56 = vmul.f32 %v1378_v3, %v753_v14  ;;  %v868_v53 = vmul.f32 %v1381_v28, %v753_v14 }
 0x167   : > { %v1353_v33 = vpop.eup %1352  ;;  %994 = vmatprep.subr.bf16.mxu0 %v913_v15  ;;  %v867_v30 = vmul.f32 %v1382_v31, %v752_v16  ;;  %v866_v1 = vmul.f32 %v1383_v22, %v752_v16 }
 0x168   : > { %v1355_v0 = vpop.eup %1354  ;;  %v719_v54 = vmul.f32 16.0, %v1353_v33 }
 0x169   : > { %v718_v17 = vmul.f32 16.0, %v1355_v0  ;;  %v945_v26 = vpack.c.bf16 %v869_v56, %v867_v30  ;;  %v944_v39 = vpack.c.bf16 %v868_v53, %v866_v1 }
 0x16a   : > { %v801_v34 = vmul.f32 %v1384_v45, %v719_v54  ;;  %v800_v48 = vmul.f32 %v1389_v12, %v719_v54 }
 0x16b   : > { %v1357_v32 = vpop.eup %1356  ;;  %1035 = vmatprep.subr.bf16.mxu1 %v945_v26  ;;  %v799_v44 = vmul.f32 %v1385_v41, %v718_v17  ;;  %v798_v40 = vmul.f32 %v1388_v49, %v718_v17 }
 0x16c   : > { %v1359_v5 = vpop.eup %1358  ;;  %v751_v52 = vmul.f32 16.0, %v1357_v32  ;;  %995 = vmatpush2.bf16.xpose.msra.mxu0 %v912_v6  ;;  %1036 = vmatpush2.bf16.xpose.msra.mxu1 %v944_v39 }
 0x16d   : > { %v750_v8 = vmul.f32 16.0, %v1359_v5  ;;  %v911_v7 = vpack.c.bf16 %v801_v34, %v799_v44  ;;  %v910_v55 = vpack.c.bf16 %v800_v48, %v798_v40 }
 0x16e   : > { %v864_v38 = vmul.f32 %v1386_v46, %v751_v52  ;;  %v865_v2 = vmul.f32 %v1387_v13, %v751_v52 }
 0x16f   : > { %v862_v51 = vmul.f32 %v1390_v47, %v750_v8  ;;  %v863_v63 = vmul.f32 %v1391_v50, %v750_v8  ;;  %996 = vmatprep.subr.bf16.mxu0 %v911_v7 }
 0x171   : > { %v943_v9 = vpack.c.bf16 %v865_v2, %v863_v63  ;;  %v942_v57 = vpack.c.bf16 %v864_v38, %v862_v51 }
 0x173   : > { %1037 = vmatprep.subr.bf16.mxu1 %v943_v9 }
 0x174   : > { %997 = vmatpush2.bf16.xpose.msra.mxu0 %v910_v55  ;;  %1038 = vmatpush2.bf16.xpose.msra.mxu1 %v942_v57 }
 0x17b   : > { %999 = vmatmul.mubr.bf16.vlgmr.msra.gmra.mxu0 %v1166_v43  ;;  %1040 = vmatmul.mubr.bf16.vlgmr.msra.gmra.mxu1 %v1166_v43 }
 0x23b   : > { %v1000_v59 = vpop.f32.mrf.mxu0  ;;  %v1041_v42 = vpop.f32.mrf.mxu1 }
 0x23c   : > { %1048 = vst [vmem:[%s182_s23] sm:$0xff] %v1000_v59  ;;  %1050 = vst [vmem:[%s182_s23 + $0x10] sm:$0xff] %v1041_v42 }
 0x23d   : > { %v1002_v62 = vpop.f32.mrf.mxu0  ;;  %v1043_v18 = vpop.f32.mrf.mxu1 }
 0x23e   : > { %1049 = vst [vmem:[%s182_s23 + $0x8] sm:$0xff] %v1002_v62  ;;  %1051 = vst [vmem:[%s182_s23 + $0x18] sm:$0xff] %v1043_v18 }
 0x23f   : > { %v1004_v61 = vpop.f32.mrf.mxu0  ;;  %v1045_v35 = vpop.f32.mrf.mxu1 }
 0x240   : > { %1457 = shalt.err (!%p1454_p8)
}
 0x241   : > { %s1458_s6 = scalar_lea.hbm %s2321_s28, 512  ;;  %s1462_s16 = scalar_lea.hbm %s2364_s2, 1024 }
 0x242   : > { %p1459_p9 = scmp.ne.s32.totalorder %s2321_s28, %s1458_s6  ;;  %p1463_p12 = scmp.lt.s32.totalorder %s2321_s28, %s2364_s2 }
 0x243   : > { %p1464_p2 = scmp.lt.s32.totalorder %s1462_s16, %s1458_s6 }
 0x244   : > { %p1460_p6 = pnand %p1459_p9, %p2548_p13 }
 0x245   : > { %p1465_p10 = por %p1464_p2, %p1463_p12 }
 0x246   : > { %p1461_p11 = pneg %p1460_p6 }
 0x248   : > { %p1466_p4 = pnand %p1465_p10, %p1461_p11 }
 0x24a   : > { %1469 = shalt.err (!%p1466_p4)
}
 0x24b   : > { %1182 = dma.vmem_to_hbm [thread:$0]  (%p2548_p13), %s2316_s7, 512, %s2321_s28, %s1053_s13   ;;  %v1005_v4 = vpop.f32.mrf.mxu0  ;;  %v1046_v20 = vpop.f32.mrf.mxu1 }
 0x24c PF: > { %s1079_s26 = sand.u32 1, %s1500_s9   ;;  %p2549_p5 = scmp.ne.s32.totalorder %s2429_s22, 0 }
 0x24d   : > { %p2550_p1 = scmp.ge.s32.totalorder %s1512_s12, 2  ;;  %s1080_s5 = scalar_lea.sflag [#allocation4], %s1079_s26 }
 0x24f   : > { %p1189_p0 = pnand %p2550_p1, %p2549_p5 }
 0x251   : > { %p1190_p7 = pneg %p1189_p0 }
 0x253   : > { %1495 = dma.done.wait (%p1190_p7), %s1080_s5, 512  }
 0x254   : > { %1497 = vsyncadd (%p1190_p7), %s1080_s5, 4294966784  ;;  %p16_p13 = scmp.ge.s32.totalorder %s1559_s15, 4   ;;  %s2551_s9 = smov %s1504_s10 }
 0x255   : > { %s2552_s10 = smov %s1508_s11  ;;  %s2553_s11 = smov %s1571_s18 }
 0x256   : > { %s2554_s12 = smov %s1559_s15  ;;  %18 = sbr.rel (!%p16_p13) target bundleno = 6 (0x6), region = 78 }
 0x25b   :  { %1085 = vsyncpa [#allocation3], 1 }
 0x25c   :  { %1087 = vsyncpa [#allocation3 + $0x1], 1 }
 0x25d   :  { %1088 = vsyncpa [#allocation6], 1 }
 0x25e   :  { %1090 = vsyncpa [#allocation6 + $0x1], 1 }
 0x25f   :  { %1091 = vsyncpa [#allocation4], 1 }
 0x260   :  { %1093 = vsyncpa [#allocation4 + $0x1], 1 }

</bundles_post_ra>
